<compile_context>
chip_gen: v7x
topology: tpu7x:2x2x1
jax: 0.10.0
libtpu: 0.0.40
codegen_flags: <defaults>
</compile_context>

<pallas_src>
import functools
import math

import jax
import jax.numpy as jnp
from jax.experimental import pallas as pl
from jax.experimental.pallas import tpu as pltpu


# ----------------------------- in-kernel helpers ----------------------------

def _gelu_tanh(x):
    # tanh-form GELU: deviates <~1e-3 from the exact erf form (well inside
    # tolerance); tanh lowers to the EUP, a separate VLIW issue slot.
    c = math.sqrt(2.0 / math.pi)
    return 0.5 * x * (1.0 + jnp.tanh(c * (x + 0.044715 * x * x * x)))


# ------------------------------ fused kernel --------------------------------

def _encoder_block_kernel(x_ref, wqkv_ref, bqkv_ref, wo_ref, w1_ref, w2_ref,
                          vec_ref, o_ref, *, num_heads):
    f32 = jnp.float32
    S, B, D = x_ref.shape
    H = num_heads
    hd = D // H

    # Single slab of small vectors (rows are lane-aligned, static slices).
    vec = vec_ref[...]                  # (8, >=128) f32
    ln_g = vec[0:1, :D]                 # LayerNorm gamma
    ln_b = vec[1:2, :D]                 # LayerNorm beta
    bo = vec[2:3, :D]                   # attention out-proj bias
    b2 = vec[3:4, :D]                   # MLP second bias
    b1 = vec[4:5, :4 * D]               # MLP first bias

    wqkv = wqkv_ref[...]                # (D, 3D); Q columns pre-scaled by 1/sqrt(hd)
    bqkv = bqkv_ref[...]                # (1, 3D); Q part pre-scaled
    wo = wo_ref[...]                    # (D, D):  out = attn @ wo
    w1 = w1_ref[...]                    # (D, 4D)
    w2 = w2_ref[...]                    # (4D, D)

    def layernorm(t):                   # LayerNorm over latent dim, eps=1e-5
        mu = jnp.mean(t, axis=-1, keepdims=True)
        var = jnp.mean(jnp.square(t - mu), axis=-1, keepdims=True)
        return (t - mu) * jax.lax.rsqrt(var + 1e-5) * ln_g + ln_b

    x3 = x_ref[...].astype(f32)         # (S, B, D), seq-first (batch_first=False)

    outs = []
    for b in range(B):                  # unrolled at trace time (B is tiny)
        xb = x3[:, b, :]                # (S, D): all tokens of batch b
        xn = layernorm(xb)

        # Fused QKV projection: one 96-lane-output matmul (scale pre-folded).
        qkv = jnp.dot(xn, wqkv, preferred_element_type=f32) + bqkv   # (S, 3D)

        heads = []
        for h in range(H):              # unrolled (heads are tiny)
            q = qkv[:, h * hd:(h + 1) * hd]
            k = qkv[:, D + h * hd:D + (h + 1) * hd]
            v = qkv[:, 2 * D + h * hd:2 * D + (h + 1) * hd]
            s = jax.lax.dot_general(q, k, (((1,), (1,)), ((), ())),
                                    preferred_element_type=f32)       # (S, S)
            s = s - jnp.max(s, axis=-1, keepdims=True)
            e = jnp.exp(s)
            p = e * pl.reciprocal(jnp.sum(e, axis=-1, keepdims=True))  # exact
            heads.append(jnp.dot(p, v, preferred_element_type=f32))   # (S, hd)

        attn = jnp.concatenate(heads, axis=-1)                        # (S, D)
        # Single output projection + first residual.
        first_added = jnp.dot(attn, wo, preferred_element_type=f32) + bo + xb

        # Second LayerNorm + MLP (Linear -> GELU -> Linear) + second residual.
        yn = layernorm(first_added)
        hmid = jnp.dot(yn, w1, preferred_element_type=f32) + b1
        hmid = _gelu_tanh(hmid)
        outb = jnp.dot(hmid, w2, preferred_element_type=f32) + b2 + first_added
        outs.append(outb)

    # One full-block store in the original (S, B, D) layout.
    o_ref[...] = jnp.stack(outs, axis=1).astype(o_ref.dtype)
    # TODO(synk): nn.Dropout layers (p=0.1) are identities here (eval semantics).


# ------------------------------- host wrapper --------------------------------

def prepare_params(p, num_heads):
    """One-time host-side repack into fused, lane-dense weight layouts."""
    D = p["ln_gamma"].shape[0]
    hd = D // num_heads
    scale = 1.0 / math.sqrt(hd)

    # Fused QKV weight/bias, columns ordered [Q | K | V]; fold the attention
    # scale into the Q columns (PyTorch scales q AFTER adding the bias).
    wqkv = p["in_proj_w"].T                        # (D, 3D)
    bqkv = p["in_proj_b"].reshape(1, 3 * D)
    col_scale = jnp.concatenate(
        [jnp.full((D,), scale, jnp.float32), jnp.ones((2 * D,), jnp.float32)])
    wqkv = wqkv * col_scale[None, :]
    bqkv = bqkv * col_scale[None, :]

    # All small (1,D)/(1,4D) vectors packed into a single (8,128)-aligned slab.
    W = max(128, 4 * D)
    slab = jnp.zeros((8, W), jnp.float32)
    slab = slab.at[0, :D].set(p["ln_gamma"])
    slab = slab.at[1, :D].set(p["ln_beta"])
    slab = slab.at[2, :D].set(p["out_proj_b"])
    slab = slab.at[3, :D].set(p["b2"])
    slab = slab.at[4, :4 * D].set(p["b1"])

    return {
        "wqkv": wqkv, "bqkv": bqkv,
        "wo": p["out_proj_w"].T,                   # (D, D)   out = attn @ wo
        "w1t": p["w1"].T,                          # (D, 4D)
        "w2t": p["w2"].T,                          # (4D, D)
        "vec": slab,                               # (8, 128)
    }


def encoder_block(x, p, *, num_heads):
    """x: (S, B, D) — PyTorch MultiheadAttention batch_first=False layout."""
    S, B, D = x.shape
    vmem = pl.BlockSpec(memory_space=pltpu.MemorySpace.VMEM)
    # Single invocation (no grid): the whole block fits trivially in VMEM and
    # every extra grid step on a single-TC chip would be pure overhead.
    return pl.pallas_call(
        functools.partial(_encoder_block_kernel, num_heads=num_heads),
        out_shape=jax.ShapeDtypeStruct((S, B, D), x.dtype),
        in_specs=[vmem] * 7,
        out_specs=vmem,
    )(x, p["wqkv"], p["bqkv"], p["wo"], p["w1t"], p["w2t"], p["vec"])


encoder_block_jit = jax.jit(encoder_block, static_argnames=("num_heads",))


# --------------------------- pure-JAX reference ------------------------------

def encoder_block_ref(x, p, num_heads):
    S, B, D = x.shape
    H = num_heads
    hd = D // H

    def ln(t):
        mu = jnp.mean(t, axis=-1, keepdims=True)
        var = jnp.mean((t - mu) ** 2, axis=-1, keepdims=True)
        return (t - mu) / jnp.sqrt(var + 1e-5) * p["ln_gamma"] + p["ln_beta"]

    x2 = x.reshape(S * B, D)
    xn = ln(x2)
    qkv = xn @ p["in_proj_w"].T + p["in_proj_b"]
    q, k, v = qkv[:, :D], qkv[:, D:2 * D], qkv[:, 2 * D:]

    def to_heads(t):
        return t.reshape(S, B, H, hd).transpose(1, 2, 0, 3).reshape(B * H, S, hd)

    qh, kh, vh = map(to_heads, (q, k, v))
    s = jnp.einsum("nqd,nkd->nqk", qh, kh) / math.sqrt(hd)
    pmat = jax.nn.softmax(s, axis=-1)
    attn = jnp.einsum("nqk,nkd->nqd", pmat, vh)
    attn = attn.reshape(B, H, S, hd).transpose(2, 0, 1, 3).reshape(S * B, D)
    first_added = attn @ p["out_proj_w"].T + p["out_proj_b"] + x2
    yn = ln(first_added)
    h = yn @ p["w1"].T + p["b1"]
    h = 0.5 * h * (1.0 + jax.lax.erf(h / math.sqrt(2.0)))     # exact erf GELU
    out = h @ p["w2"].T + p["b2"] + first_added
    return out.reshape(S, B, D)


# ---------------------------------- main --------------------------------------

if __name__ == "__main__":
    S, B, D, H = 8, 2, 32, 4   # seq, batch, latent, heads (head_dim = 8)

    keys = jax.random.split(jax.random.PRNGKey(0), 11)
    f32 = jnp.float32
    params = {
        "ln_gamma":   1.0 + 0.05 * jax.random.normal(keys[0], (D,), f32),
        "ln_beta":    0.05 * jax.random.normal(keys[1], (D,), f32),
        "in_proj_w":  0.02 * jax.random.normal(keys[2], (3 * D, D), f32),
        "in_proj_b":  0.02 * jax.random.normal(keys[3], (3 * D,), f32),
        "out_proj_w": 0.02 * jax.random.normal(keys[4], (D, D), f32),
        "out_proj_b": 0.02 * jax.random.normal(keys[5], (D,), f32),
        "w1":         0.02 * jax.random.normal(keys[6], (4 * D, D), f32),
        "b1":         0.02 * jax.random.normal(keys[7], (4 * D,), f32),
        "w2":         0.02 * jax.random.normal(keys[8], (D, 4 * D), f32),
        "b2":         0.02 * jax.random.normal(keys[9], (D,), f32),
    }
    x = jax.random.normal(keys[10], (S, B, D), f32)

    prepped = prepare_params(params, H)          # one-time weight repack
    out = jax.block_until_ready(encoder_block_jit(x, prepped, num_heads=H))
    ref = jax.block_until_ready(encoder_block_ref(x, params, H))

    assert out.shape == (S, B, D)
    err = float(jnp.max(jnp.abs(out - ref)))
    assert err < 5e-3, f"mismatch vs reference: {err}"
    print("KERNEL_OK")
</pallas_src>

<mosaic_0001>
module attributes {stable_mosaic.version = 11 : i64} {
  func.func @_encoder_block_kernel(%arg0: memref<8x2x32xf32, #tpu.memory_space<vmem>>, %arg1: memref<32x96xf32, #tpu.memory_space<vmem>>, %arg2: memref<1x96xf32, #tpu.memory_space<vmem>>, %arg3: memref<32x32xf32, #tpu.memory_space<vmem>>, %arg4: memref<32x128xf32, #tpu.memory_space<vmem>>, %arg5: memref<128x32xf32, #tpu.memory_space<vmem>>, %arg6: memref<8x128xf32, #tpu.memory_space<vmem>>, %arg7: memref<8x2x32xf32, #tpu.memory_space<vmem>>) attributes {dimension_semantics = [], scalar_prefetch = 0 : i64, scratch_operands = 0 : i64, tpu.core_type = #tpu.core_type<tc>} {
    %c0 = arith.constant 0 : index
    %c0_0 = arith.constant 0 : index
    %0 = vector.load %arg6[%c0, %c0_0] : memref<8x128xf32, #tpu.memory_space<vmem>>, vector<8x128xf32>
    %1 = vector.extract_strided_slice %0 {offsets = [0, 0], sizes = [1, 32], strides = [1, 1]} : vector<8x128xf32> to vector<1x32xf32>
    %2 = vector.extract_strided_slice %0 {offsets = [1, 0], sizes = [1, 32], strides = [1, 1]} : vector<8x128xf32> to vector<1x32xf32>
    %3 = vector.extract_strided_slice %0 {offsets = [2, 0], sizes = [1, 32], strides = [1, 1]} : vector<8x128xf32> to vector<1x32xf32>
    %4 = vector.extract_strided_slice %0 {offsets = [3, 0], sizes = [1, 32], strides = [1, 1]} : vector<8x128xf32> to vector<1x32xf32>
    %5 = vector.extract_strided_slice %0 {offsets = [4, 0], sizes = [1, 128], strides = [1, 1]} : vector<8x128xf32> to vector<1x128xf32>
    %c0_1 = arith.constant 0 : index
    %c0_2 = arith.constant 0 : index
    %6 = vector.load %arg1[%c0_1, %c0_2] : memref<32x96xf32, #tpu.memory_space<vmem>>, vector<32x96xf32>
    %c0_3 = arith.constant 0 : index
    %c0_4 = arith.constant 0 : index
    %7 = vector.load %arg2[%c0_3, %c0_4] : memref<1x96xf32, #tpu.memory_space<vmem>>, vector<1x96xf32>
    %c0_5 = arith.constant 0 : index
    %c0_6 = arith.constant 0 : index
    %8 = vector.load %arg3[%c0_5, %c0_6] : memref<32x32xf32, #tpu.memory_space<vmem>>, vector<32x32xf32>
    %c0_7 = arith.constant 0 : index
    %c0_8 = arith.constant 0 : index
    %9 = vector.load %arg4[%c0_7, %c0_8] : memref<32x128xf32, #tpu.memory_space<vmem>>, vector<32x128xf32>
    %c0_9 = arith.constant 0 : index
    %c0_10 = arith.constant 0 : index
    %10 = vector.load %arg5[%c0_9, %c0_10] : memref<128x32xf32, #tpu.memory_space<vmem>>, vector<128x32xf32>
    %c0_11 = arith.constant 0 : index
    %c0_12 = arith.constant 0 : index
    %c0_13 = arith.constant 0 : index
    %11 = vector.load %arg0[%c0_11, %c0_12, %c0_13] : memref<8x2x32xf32, #tpu.memory_space<vmem>>, vector<8x2x32xf32>
    %12 = vector.extract_strided_slice %11 {offsets = [0, 0, 0], sizes = [8, 1, 32], strides = [1, 1, 1]} : vector<8x2x32xf32> to vector<8x1x32xf32>
    %13 = vector.shape_cast %12 : vector<8x1x32xf32> to vector<8x32xf32>
    %cst = arith.constant dense<0.000000e+00> : vector<8xf32>
    %14 = vector.multi_reduction <add>, %13, %cst [1] : vector<8x32xf32> to vector<8xf32>
    %15 = vector.shape_cast %14 : vector<8xf32> to vector<8x1xf32>
    %cst_14 = arith.constant 3.200000e+01 : f32
    %16 = vector.broadcast %cst_14 : f32 to vector<8x1xf32>
    %17 = arith.divf %15, %16 : vector<8x1xf32>
    %18 = vector.broadcast %17 : vector<8x1xf32> to vector<8x32xf32>
    %19 = arith.subf %13, %18 : vector<8x32xf32>
    %20 = arith.mulf %19, %19 : vector<8x32xf32>
    %cst_15 = arith.constant dense<0.000000e+00> : vector<8xf32>
    %21 = vector.multi_reduction <add>, %20, %cst_15 [1] : vector<8x32xf32> to vector<8xf32>
    %22 = vector.shape_cast %21 : vector<8xf32> to vector<8x1xf32>
    %cst_16 = arith.constant 3.200000e+01 : f32
    %23 = vector.broadcast %cst_16 : f32 to vector<8x1xf32>
    %24 = arith.divf %22, %23 : vector<8x1xf32>
    %25 = vector.broadcast %17 : vector<8x1xf32> to vector<8x32xf32>
    %26 = arith.subf %13, %25 : vector<8x32xf32>
    %cst_17 = arith.constant 9.99999974E-6 : f32
    %27 = vector.broadcast %cst_17 : f32 to vector<8x1xf32>
    %28 = arith.addf %24, %27 : vector<8x1xf32>
    %29 = math.rsqrt %28 : vector<8x1xf32>
    %30 = vector.broadcast %29 : vector<8x1xf32> to vector<8x32xf32>
    %31 = arith.mulf %26, %30 : vector<8x32xf32>
    %32 = vector.broadcast %1 : vector<1x32xf32> to vector<8x32xf32>
    %33 = arith.mulf %31, %32 : vector<8x32xf32>
    %34 = vector.broadcast %2 : vector<1x32xf32> to vector<8x32xf32>
    %35 = arith.addf %33, %34 : vector<8x32xf32>
    %cst_18 = arith.constant dense<0.000000e+00> : vector<8x96xf32>
    %36 = tpu.matmul %35, %6, %cst_18 {dimension_numbers = #tpu.dot_dimension_numbers<[1], [0], [0], [1], [0, 0, 1, 1], [], []>} : vector<8x32xf32>, vector<32x96xf32>, vector<8x96xf32> -> vector<8x96xf32>
    %37 = vector.broadcast %7 : vector<1x96xf32> to vector<8x96xf32>
    %38 = arith.addf %36, %37 : vector<8x96xf32>
    %39 = vector.extract_strided_slice %38 {offsets = [0, 0], sizes = [8, 8], strides = [1, 1]} : vector<8x96xf32> to vector<8x8xf32>
    %40 = vector.extract_strided_slice %38 {offsets = [0, 32], sizes = [8, 8], strides = [1, 1]} : vector<8x96xf32> to vector<8x8xf32>
    %41 = vector.extract_strided_slice %38 {offsets = [0, 64], sizes = [8, 8], strides = [1, 1]} : vector<8x96xf32> to vector<8x8xf32>
    %cst_19 = arith.constant dense<0.000000e+00> : vector<8x8xf32>
    %42 = tpu.matmul %39, %40, %cst_19 {dimension_numbers = #tpu.dot_dimension_numbers<[1], [1], [0], [0], [0, 0, 1, 0], [], []>} : vector<8x8xf32>, vector<8x8xf32>, vector<8x8xf32> -> vector<8x8xf32>
    %cst_20 = arith.constant dense<0xFF800000> : vector<8xf32>
    %43 = vector.multi_reduction <maximumf>, %42, %cst_20 [1] : vector<8x8xf32> to vector<8xf32>
    %44 = vector.shape_cast %43 : vector<8xf32> to vector<8x1xf32>
    %45 = vector.broadcast %44 : vector<8x1xf32> to vector<8x8xf32>
    %46 = arith.subf %42, %45 : vector<8x8xf32>
    %47 = math.exp %46 : vector<8x8xf32>
    %cst_21 = arith.constant dense<0.000000e+00> : vector<8xf32>
    %48 = vector.multi_reduction <add>, %47, %cst_21 [1] : vector<8x8xf32> to vector<8xf32>
    %49 = vector.shape_cast %48 : vector<8xf32> to vector<8x1xf32>
    %50 = tpu.reciprocal %49 : vector<8x1xf32> -> vector<8x1xf32>
    %51 = vector.broadcast %50 : vector<8x1xf32> to vector<8x8xf32>
    %52 = arith.mulf %47, %51 : vector<8x8xf32>
    %cst_22 = arith.constant dense<0.000000e+00> : vector<8x8xf32>
    %53 = tpu.matmul %52, %41, %cst_22 {dimension_numbers = #tpu.dot_dimension_numbers<[1], [0], [0], [1], [0, 0, 1, 1], [], []>} : vector<8x8xf32>, vector<8x8xf32>, vector<8x8xf32> -> vector<8x8xf32>
    %54 = vector.extract_strided_slice %38 {offsets = [0, 8], sizes = [8, 8], strides = [1, 1]} : vector<8x96xf32> to vector<8x8xf32>
    %55 = vector.extract_strided_slice %38 {offsets = [0, 40], sizes = [8, 8], strides = [1, 1]} : vector<8x96xf32> to vector<8x8xf32>
    %56 = vector.extract_strided_slice %38 {offsets = [0, 72], sizes = [8, 8], strides = [1, 1]} : vector<8x96xf32> to vector<8x8xf32>
    %cst_23 = arith.constant dense<0.000000e+00> : vector<8x8xf32>
    %57 = tpu.matmul %54, %55, %cst_23 {dimension_numbers = #tpu.dot_dimension_numbers<[1], [1], [0], [0], [0, 0, 1, 0], [], []>} : vector<8x8xf32>, vector<8x8xf32>, vector<8x8xf32> -> vector<8x8xf32>
    %cst_24 = arith.constant dense<0xFF800000> : vector<8xf32>
    %58 = vector.multi_reduction <maximumf>, %57, %cst_24 [1] : vector<8x8xf32> to vector<8xf32>
    %59 = vector.shape_cast %58 : vector<8xf32> to vector<8x1xf32>
    %60 = vector.broadcast %59 : vector<8x1xf32> to vector<8x8xf32>
    %61 = arith.subf %57, %60 : vector<8x8xf32>
    %62 = math.exp %61 : vector<8x8xf32>
    %cst_25 = arith.constant dense<0.000000e+00> : vector<8xf32>
    %63 = vector.multi_reduction <add>, %62, %cst_25 [1] : vector<8x8xf32> to vector<8xf32>
    %64 = vector.shape_cast %63 : vector<8xf32> to vector<8x1xf32>
    %65 = tpu.reciprocal %64 : vector<8x1xf32> -> vector<8x1xf32>
    %66 = vector.broadcast %65 : vector<8x1xf32> to vector<8x8xf32>
    %67 = arith.mulf %62, %66 : vector<8x8xf32>
    %cst_26 = arith.constant dense<0.000000e+00> : vector<8x8xf32>
    %68 = tpu.matmul %67, %56, %cst_26 {dimension_numbers = #tpu.dot_dimension_numbers<[1], [0], [0], [1], [0, 0, 1, 1], [], []>} : vector<8x8xf32>, vector<8x8xf32>, vector<8x8xf32> -> vector<8x8xf32>
    %69 = vector.extract_strided_slice %38 {offsets = [0, 16], sizes = [8, 8], strides = [1, 1]} : vector<8x96xf32> to vector<8x8xf32>
    %70 = vector.extract_strided_slice %38 {offsets = [0, 48], sizes = [8, 8], strides = [1, 1]} : vector<8x96xf32> to vector<8x8xf32>
    %71 = vector.extract_strided_slice %38 {offsets = [0, 80], sizes = [8, 8], strides = [1, 1]} : vector<8x96xf32> to vector<8x8xf32>
    %cst_27 = arith.constant dense<0.000000e+00> : vector<8x8xf32>
    %72 = tpu.matmul %69, %70, %cst_27 {dimension_numbers = #tpu.dot_dimension_numbers<[1], [1], [0], [0], [0, 0, 1, 0], [], []>} : vector<8x8xf32>, vector<8x8xf32>, vector<8x8xf32> -> vector<8x8xf32>
    %cst_28 = arith.constant dense<0xFF800000> : vector<8xf32>
    %73 = vector.multi_reduction <maximumf>, %72, %cst_28 [1] : vector<8x8xf32> to vector<8xf32>
    %74 = vector.shape_cast %73 : vector<8xf32> to vector<8x1xf32>
    %75 = vector.broadcast %74 : vector<8x1xf32> to vector<8x8xf32>
    %76 = arith.subf %72, %75 : vector<8x8xf32>
    %77 = math.exp %76 : vector<8x8xf32>
    %cst_29 = arith.constant dense<0.000000e+00> : vector<8xf32>
    %78 = vector.multi_reduction <add>, %77, %cst_29 [1] : vector<8x8xf32> to vector<8xf32>
    %79 = vector.shape_cast %78 : vector<8xf32> to vector<8x1xf32>
    %80 = tpu.reciprocal %79 : vector<8x1xf32> -> vector<8x1xf32>
    %81 = vector.broadcast %80 : vector<8x1xf32> to vector<8x8xf32>
    %82 = arith.mulf %77, %81 : vector<8x8xf32>
    %cst_30 = arith.constant dense<0.000000e+00> : vector<8x8xf32>
    %83 = tpu.matmul %82, %71, %cst_30 {dimension_numbers = #tpu.dot_dimension_numbers<[1], [0], [0], [1], [0, 0, 1, 1], [], []>} : vector<8x8xf32>, vector<8x8xf32>, vector<8x8xf32> -> vector<8x8xf32>
    %84 = vector.extract_strided_slice %38 {offsets = [0, 24], sizes = [8, 8], strides = [1, 1]} : vector<8x96xf32> to vector<8x8xf32>
    %85 = vector.extract_strided_slice %38 {offsets = [0, 56], sizes = [8, 8], strides = [1, 1]} : vector<8x96xf32> to vector<8x8xf32>
    %86 = vector.extract_strided_slice %38 {offsets = [0, 88], sizes = [8, 8], strides = [1, 1]} : vector<8x96xf32> to vector<8x8xf32>
    %cst_31 = arith.constant dense<0.000000e+00> : vector<8x8xf32>
    %87 = tpu.matmul %84, %85, %cst_31 {dimension_numbers = #tpu.dot_dimension_numbers<[1], [1], [0], [0], [0, 0, 1, 0], [], []>} : vector<8x8xf32>, vector<8x8xf32>, vector<8x8xf32> -> vector<8x8xf32>
    %cst_32 = arith.constant dense<0xFF800000> : vector<8xf32>
    %88 = vector.multi_reduction <maximumf>, %87, %cst_32 [1] : vector<8x8xf32> to vector<8xf32>
    %89 = vector.shape_cast %88 : vector<8xf32> to vector<8x1xf32>
    %90 = vector.broadcast %89 : vector<8x1xf32> to vector<8x8xf32>
    %91 = arith.subf %87, %90 : vector<8x8xf32>
    %92 = math.exp %91 : vector<8x8xf32>
    %cst_33 = arith.constant dense<0.000000e+00> : vector<8xf32>
    %93 = vector.multi_reduction <add>, %92, %cst_33 [1] : vector<8x8xf32> to vector<8xf32>
    %94 = vector.shape_cast %93 : vector<8xf32> to vector<8x1xf32>
    %95 = tpu.reciprocal %94 : vector<8x1xf32> -> vector<8x1xf32>
    %96 = vector.broadcast %95 : vector<8x1xf32> to vector<8x8xf32>
    %97 = arith.mulf %92, %96 : vector<8x8xf32>
    %cst_34 = arith.constant dense<0.000000e+00> : vector<8x8xf32>
    %98 = tpu.matmul %97, %86, %cst_34 {dimension_numbers = #tpu.dot_dimension_numbers<[1], [0], [0], [1], [0, 0, 1, 1], [], []>} : vector<8x8xf32>, vector<8x8xf32>, vector<8x8xf32> -> vector<8x8xf32>
    %99 = tpu.concatenate %53, %68, %83, %98 in 1 : vector<8x8xf32>, vector<8x8xf32>, vector<8x8xf32>, vector<8x8xf32> -> vector<8x32xf32>
    %cst_35 = arith.constant dense<0.000000e+00> : vector<8x32xf32>
    %100 = tpu.matmul %99, %8, %cst_35 {dimension_numbers = #tpu.dot_dimension_numbers<[1], [0], [0], [1], [0, 0, 1, 1], [], []>} : vector<8x32xf32>, vector<32x32xf32>, vector<8x32xf32> -> vector<8x32xf32>
    %101 = vector.broadcast %3 : vector<1x32xf32> to vector<8x32xf32>
    %102 = arith.addf %100, %101 : vector<8x32xf32>
    %103 = arith.addf %102, %13 : vector<8x32xf32>
    %cst_36 = arith.constant dense<0.000000e+00> : vector<8xf32>
    %104 = vector.multi_reduction <add>, %103, %cst_36 [1] : vector<8x32xf32> to vector<8xf32>
    %105 = vector.shape_cast %104 : vector<8xf32> to vector<8x1xf32>
    %cst_37 = arith.constant 3.200000e+01 : f32
    %106 = vector.broadcast %cst_37 : f32 to vector<8x1xf32>
    %107 = arith.divf %105, %106 : vector<8x1xf32>
    %108 = vector.broadcast %107 : vector<8x1xf32> to vector<8x32xf32>
    %109 = arith.subf %103, %108 : vector<8x32xf32>
    %110 = arith.mulf %109, %109 : vector<8x32xf32>
    %cst_38 = arith.constant dense<0.000000e+00> : vector<8xf32>
    %111 = vector.multi_reduction <add>, %110, %cst_38 [1] : vector<8x32xf32> to vector<8xf32>
    %112 = vector.shape_cast %111 : vector<8xf32> to vector<8x1xf32>
    %cst_39 = arith.constant 3.200000e+01 : f32
    %113 = vector.broadcast %cst_39 : f32 to vector<8x1xf32>
    %114 = arith.divf %112, %113 : vector<8x1xf32>
    %115 = vector.broadcast %107 : vector<8x1xf32> to vector<8x32xf32>
    %116 = arith.subf %103, %115 : vector<8x32xf32>
    %cst_40 = arith.constant 9.99999974E-6 : f32
    %117 = vector.broadcast %cst_40 : f32 to vector<8x1xf32>
    %118 = arith.addf %114, %117 : vector<8x1xf32>
    %119 = math.rsqrt %118 : vector<8x1xf32>
    %120 = vector.broadcast %119 : vector<8x1xf32> to vector<8x32xf32>
    %121 = arith.mulf %116, %120 : vector<8x32xf32>
    %122 = vector.broadcast %1 : vector<1x32xf32> to vector<8x32xf32>
    %123 = arith.mulf %121, %122 : vector<8x32xf32>
    %124 = vector.broadcast %2 : vector<1x32xf32> to vector<8x32xf32>
    %125 = arith.addf %123, %124 : vector<8x32xf32>
    %cst_41 = arith.constant dense<0.000000e+00> : vector<8x128xf32>
    %126 = tpu.matmul %125, %9, %cst_41 {dimension_numbers = #tpu.dot_dimension_numbers<[1], [0], [0], [1], [0, 0, 1, 1], [], []>} : vector<8x32xf32>, vector<32x128xf32>, vector<8x128xf32> -> vector<8x128xf32>
    %127 = vector.broadcast %5 : vector<1x128xf32> to vector<8x128xf32>
    %128 = arith.addf %126, %127 : vector<8x128xf32>
    %cst_42 = arith.constant 5.000000e-01 : f32
    %129 = vector.broadcast %cst_42 : f32 to vector<8x128xf32>
    %130 = arith.mulf %129, %128 : vector<8x128xf32>
    %cst_43 = arith.constant 4.471500e-02 : f32
    %131 = vector.broadcast %cst_43 : f32 to vector<8x128xf32>
    %132 = arith.mulf %131, %128 : vector<8x128xf32>
    %133 = arith.mulf %132, %128 : vector<8x128xf32>
    %134 = arith.mulf %133, %128 : vector<8x128xf32>
    %135 = arith.addf %128, %134 : vector<8x128xf32>
    %cst_44 = arith.constant 0.797884583 : f32
    %136 = vector.broadcast %cst_44 : f32 to vector<8x128xf32>
    %137 = arith.mulf %136, %135 : vector<8x128xf32>
    %138 = math.tanh %137 : vector<8x128xf32>
    %cst_45 = arith.constant 1.000000e+00 : f32
    %139 = vector.broadcast %cst_45 : f32 to vector<8x128xf32>
    %140 = arith.addf %139, %138 : vector<8x128xf32>
    %141 = arith.mulf %130, %140 : vector<8x128xf32>
    %cst_46 = arith.constant dense<0.000000e+00> : vector<8x32xf32>
    %142 = tpu.matmul %141, %10, %cst_46 {dimension_numbers = #tpu.dot_dimension_numbers<[1], [0], [0], [1], [0, 0, 1, 1], [], []>} : vector<8x128xf32>, vector<128x32xf32>, vector<8x32xf32> -> vector<8x32xf32>
    %143 = vector.broadcast %4 : vector<1x32xf32> to vector<8x32xf32>
    %144 = arith.addf %142, %143 : vector<8x32xf32>
    %145 = arith.addf %144, %103 : vector<8x32xf32>
    %146 = vector.extract_strided_slice %11 {offsets = [0, 1, 0], sizes = [8, 1, 32], strides = [1, 1, 1]} : vector<8x2x32xf32> to vector<8x1x32xf32>
    %147 = vector.shape_cast %146 : vector<8x1x32xf32> to vector<8x32xf32>
    %cst_47 = arith.constant dense<0.000000e+00> : vector<8xf32>
    %148 = vector.multi_reduction <add>, %147, %cst_47 [1] : vector<8x32xf32> to vector<8xf32>
    %149 = vector.shape_cast %148 : vector<8xf32> to vector<8x1xf32>
    %cst_48 = arith.constant 3.200000e+01 : f32
    %150 = vector.broadcast %cst_48 : f32 to vector<8x1xf32>
    %151 = arith.divf %149, %150 : vector<8x1xf32>
    %152 = vector.broadcast %151 : vector<8x1xf32> to vector<8x32xf32>
    %153 = arith.subf %147, %152 : vector<8x32xf32>
    %154 = arith.mulf %153, %153 : vector<8x32xf32>
    %cst_49 = arith.constant dense<0.000000e+00> : vector<8xf32>
    %155 = vector.multi_reduction <add>, %154, %cst_49 [1] : vector<8x32xf32> to vector<8xf32>
    %156 = vector.shape_cast %155 : vector<8xf32> to vector<8x1xf32>
    %cst_50 = arith.constant 3.200000e+01 : f32
    %157 = vector.broadcast %cst_50 : f32 to vector<8x1xf32>
    %158 = arith.divf %156, %157 : vector<8x1xf32>
    %159 = vector.broadcast %151 : vector<8x1xf32> to vector<8x32xf32>
    %160 = arith.subf %147, %159 : vector<8x32xf32>
    %cst_51 = arith.constant 9.99999974E-6 : f32
    %161 = vector.broadcast %cst_51 : f32 to vector<8x1xf32>
    %162 = arith.addf %158, %161 : vector<8x1xf32>
    %163 = math.rsqrt %162 : vector<8x1xf32>
    %164 = vector.broadcast %163 : vector<8x1xf32> to vector<8x32xf32>
    %165 = arith.mulf %160, %164 : vector<8x32xf32>
    %166 = vector.broadcast %1 : vector<1x32xf32> to vector<8x32xf32>
    %167 = arith.mulf %165, %166 : vector<8x32xf32>
    %168 = vector.broadcast %2 : vector<1x32xf32> to vector<8x32xf32>
    %169 = arith.addf %167, %168 : vector<8x32xf32>
    %cst_52 = arith.constant dense<0.000000e+00> : vector<8x96xf32>
    %170 = tpu.matmul %169, %6, %cst_52 {dimension_numbers = #tpu.dot_dimension_numbers<[1], [0], [0], [1], [0, 0, 1, 1], [], []>} : vector<8x32xf32>, vector<32x96xf32>, vector<8x96xf32> -> vector<8x96xf32>
    %171 = vector.broadcast %7 : vector<1x96xf32> to vector<8x96xf32>
    %172 = arith.addf %170, %171 : vector<8x96xf32>
    %173 = vector.extract_strided_slice %172 {offsets = [0, 0], sizes = [8, 8], strides = [1, 1]} : vector<8x96xf32> to vector<8x8xf32>
    %174 = vector.extract_strided_slice %172 {offsets = [0, 32], sizes = [8, 8], strides = [1, 1]} : vector<8x96xf32> to vector<8x8xf32>
    %175 = vector.extract_strided_slice %172 {offsets = [0, 64], sizes = [8, 8], strides = [1, 1]} : vector<8x96xf32> to vector<8x8xf32>
    %cst_53 = arith.constant dense<0.000000e+00> : vector<8x8xf32>
    %176 = tpu.matmul %173, %174, %cst_53 {dimension_numbers = #tpu.dot_dimension_numbers<[1], [1], [0], [0], [0, 0, 1, 0], [], []>} : vector<8x8xf32>, vector<8x8xf32>, vector<8x8xf32> -> vector<8x8xf32>
    %cst_54 = arith.constant dense<0xFF800000> : vector<8xf32>
    %177 = vector.multi_reduction <maximumf>, %176, %cst_54 [1] : vector<8x8xf32> to vector<8xf32>
    %178 = vector.shape_cast %177 : vector<8xf32> to vector<8x1xf32>
    %179 = vector.broadcast %178 : vector<8x1xf32> to vector<8x8xf32>
    %180 = arith.subf %176, %179 : vector<8x8xf32>
    %181 = math.exp %180 : vector<8x8xf32>
    %cst_55 = arith.constant dense<0.000000e+00> : vector<8xf32>
    %182 = vector.multi_reduction <add>, %181, %cst_55 [1] : vector<8x8xf32> to vector<8xf32>
    %183 = vector.shape_cast %182 : vector<8xf32> to vector<8x1xf32>
    %184 = tpu.reciprocal %183 : vector<8x1xf32> -> vector<8x1xf32>
    %185 = vector.broadcast %184 : vector<8x1xf32> to vector<8x8xf32>
    %186 = arith.mulf %181, %185 : vector<8x8xf32>
    %cst_56 = arith.constant dense<0.000000e+00> : vector<8x8xf32>
    %187 = tpu.matmul %186, %175, %cst_56 {dimension_numbers = #tpu.dot_dimension_numbers<[1], [0], [0], [1], [0, 0, 1, 1], [], []>} : vector<8x8xf32>, vector<8x8xf32>, vector<8x8xf32> -> vector<8x8xf32>
    %188 = vector.extract_strided_slice %172 {offsets = [0, 8], sizes = [8, 8], strides = [1, 1]} : vector<8x96xf32> to vector<8x8xf32>
    %189 = vector.extract_strided_slice %172 {offsets = [0, 40], sizes = [8, 8], strides = [1, 1]} : vector<8x96xf32> to vector<8x8xf32>
    %190 = vector.extract_strided_slice %172 {offsets = [0, 72], sizes = [8, 8], strides = [1, 1]} : vector<8x96xf32> to vector<8x8xf32>
    %cst_57 = arith.constant dense<0.000000e+00> : vector<8x8xf32>
    %191 = tpu.matmul %188, %189, %cst_57 {dimension_numbers = #tpu.dot_dimension_numbers<[1], [1], [0], [0], [0, 0, 1, 0], [], []>} : vector<8x8xf32>, vector<8x8xf32>, vector<8x8xf32> -> vector<8x8xf32>
    %cst_58 = arith.constant dense<0xFF800000> : vector<8xf32>
    %192 = vector.multi_reduction <maximumf>, %191, %cst_58 [1] : vector<8x8xf32> to vector<8xf32>
    %193 = vector.shape_cast %192 : vector<8xf32> to vector<8x1xf32>
    %194 = vector.broadcast %193 : vector<8x1xf32> to vector<8x8xf32>
    %195 = arith.subf %191, %194 : vector<8x8xf32>
    %196 = math.exp %195 : vector<8x8xf32>
    %cst_59 = arith.constant dense<0.000000e+00> : vector<8xf32>
    %197 = vector.multi_reduction <add>, %196, %cst_59 [1] : vector<8x8xf32> to vector<8xf32>
    %198 = vector.shape_cast %197 : vector<8xf32> to vector<8x1xf32>
    %199 = tpu.reciprocal %198 : vector<8x1xf32> -> vector<8x1xf32>
    %200 = vector.broadcast %199 : vector<8x1xf32> to vector<8x8xf32>
    %201 = arith.mulf %196, %200 : vector<8x8xf32>
    %cst_60 = arith.constant dense<0.000000e+00> : vector<8x8xf32>
    %202 = tpu.matmul %201, %190, %cst_60 {dimension_numbers = #tpu.dot_dimension_numbers<[1], [0], [0], [1], [0, 0, 1, 1], [], []>} : vector<8x8xf32>, vector<8x8xf32>, vector<8x8xf32> -> vector<8x8xf32>
    %203 = vector.extract_strided_slice %172 {offsets = [0, 16], sizes = [8, 8], strides = [1, 1]} : vector<8x96xf32> to vector<8x8xf32>
    %204 = vector.extract_strided_slice %172 {offsets = [0, 48], sizes = [8, 8], strides = [1, 1]} : vector<8x96xf32> to vector<8x8xf32>
    %205 = vector.extract_strided_slice %172 {offsets = [0, 80], sizes = [8, 8], strides = [1, 1]} : vector<8x96xf32> to vector<8x8xf32>
    %cst_61 = arith.constant dense<0.000000e+00> : vector<8x8xf32>
    %206 = tpu.matmul %203, %204, %cst_61 {dimension_numbers = #tpu.dot_dimension_numbers<[1], [1], [0], [0], [0, 0, 1, 0], [], []>} : vector<8x8xf32>, vector<8x8xf32>, vector<8x8xf32> -> vector<8x8xf32>
    %cst_62 = arith.constant dense<0xFF800000> : vector<8xf32>
    %207 = vector.multi_reduction <maximumf>, %206, %cst_62 [1] : vector<8x8xf32> to vector<8xf32>
    %208 = vector.shape_cast %207 : vector<8xf32> to vector<8x1xf32>
    %209 = vector.broadcast %208 : vector<8x1xf32> to vector<8x8xf32>
    %210 = arith.subf %206, %209 : vector<8x8xf32>
    %211 = math.exp %210 : vector<8x8xf32>
    %cst_63 = arith.constant dense<0.000000e+00> : vector<8xf32>
    %212 = vector.multi_reduction <add>, %211, %cst_63 [1] : vector<8x8xf32> to vector<8xf32>
    %213 = vector.shape_cast %212 : vector<8xf32> to vector<8x1xf32>
    %214 = tpu.reciprocal %213 : vector<8x1xf32> -> vector<8x1xf32>
    %215 = vector.broadcast %214 : vector<8x1xf32> to vector<8x8xf32>
    %216 = arith.mulf %211, %215 : vector<8x8xf32>
    %cst_64 = arith.constant dense<0.000000e+00> : vector<8x8xf32>
    %217 = tpu.matmul %216, %205, %cst_64 {dimension_numbers = #tpu.dot_dimension_numbers<[1], [0], [0], [1], [0, 0, 1, 1], [], []>} : vector<8x8xf32>, vector<8x8xf32>, vector<8x8xf32> -> vector<8x8xf32>
    %218 = vector.extract_strided_slice %172 {offsets = [0, 24], sizes = [8, 8], strides = [1, 1]} : vector<8x96xf32> to vector<8x8xf32>
    %219 = vector.extract_strided_slice %172 {offsets = [0, 56], sizes = [8, 8], strides = [1, 1]} : vector<8x96xf32> to vector<8x8xf32>
    %220 = vector.extract_strided_slice %172 {offsets = [0, 88], sizes = [8, 8], strides = [1, 1]} : vector<8x96xf32> to vector<8x8xf32>
    %cst_65 = arith.constant dense<0.000000e+00> : vector<8x8xf32>
    %221 = tpu.matmul %218, %219, %cst_65 {dimension_numbers = #tpu.dot_dimension_numbers<[1], [1], [0], [0], [0, 0, 1, 0], [], []>} : vector<8x8xf32>, vector<8x8xf32>, vector<8x8xf32> -> vector<8x8xf32>
    %cst_66 = arith.constant dense<0xFF800000> : vector<8xf32>
    %222 = vector.multi_reduction <maximumf>, %221, %cst_66 [1] : vector<8x8xf32> to vector<8xf32>
    %223 = vector.shape_cast %222 : vector<8xf32> to vector<8x1xf32>
    %224 = vector.broadcast %223 : vector<8x1xf32> to vector<8x8xf32>
    %225 = arith.subf %221, %224 : vector<8x8xf32>
    %226 = math.exp %225 : vector<8x8xf32>
    %cst_67 = arith.constant dense<0.000000e+00> : vector<8xf32>
    %227 = vector.multi_reduction <add>, %226, %cst_67 [1] : vector<8x8xf32> to vector<8xf32>
    %228 = vector.shape_cast %227 : vector<8xf32> to vector<8x1xf32>
    %229 = tpu.reciprocal %228 : vector<8x1xf32> -> vector<8x1xf32>
    %230 = vector.broadcast %229 : vector<8x1xf32> to vector<8x8xf32>
    %231 = arith.mulf %226, %230 : vector<8x8xf32>
    %cst_68 = arith.constant dense<0.000000e+00> : vector<8x8xf32>
    %232 = tpu.matmul %231, %220, %cst_68 {dimension_numbers = #tpu.dot_dimension_numbers<[1], [0], [0], [1], [0, 0, 1, 1], [], []>} : vector<8x8xf32>, vector<8x8xf32>, vector<8x8xf32> -> vector<8x8xf32>
    %233 = tpu.concatenate %187, %202, %217, %232 in 1 : vector<8x8xf32>, vector<8x8xf32>, vector<8x8xf32>, vector<8x8xf32> -> vector<8x32xf32>
    %cst_69 = arith.constant dense<0.000000e+00> : vector<8x32xf32>
    %234 = tpu.matmul %233, %8, %cst_69 {dimension_numbers = #tpu.dot_dimension_numbers<[1], [0], [0], [1], [0, 0, 1, 1], [], []>} : vector<8x32xf32>, vector<32x32xf32>, vector<8x32xf32> -> vector<8x32xf32>
    %235 = vector.broadcast %3 : vector<1x32xf32> to vector<8x32xf32>
    %236 = arith.addf %234, %235 : vector<8x32xf32>
    %237 = arith.addf %236, %147 : vector<8x32xf32>
    %cst_70 = arith.constant dense<0.000000e+00> : vector<8xf32>
    %238 = vector.multi_reduction <add>, %237, %cst_70 [1] : vector<8x32xf32> to vector<8xf32>
    %239 = vector.shape_cast %238 : vector<8xf32> to vector<8x1xf32>
    %cst_71 = arith.constant 3.200000e+01 : f32
    %240 = vector.broadcast %cst_71 : f32 to vector<8x1xf32>
    %241 = arith.divf %239, %240 : vector<8x1xf32>
    %242 = vector.broadcast %241 : vector<8x1xf32> to vector<8x32xf32>
    %243 = arith.subf %237, %242 : vector<8x32xf32>
    %244 = arith.mulf %243, %243 : vector<8x32xf32>
    %cst_72 = arith.constant dense<0.000000e+00> : vector<8xf32>
    %245 = vector.multi_reduction <add>, %244, %cst_72 [1] : vector<8x32xf32> to vector<8xf32>
    %246 = vector.shape_cast %245 : vector<8xf32> to vector<8x1xf32>
    %cst_73 = arith.constant 3.200000e+01 : f32
    %247 = vector.broadcast %cst_73 : f32 to vector<8x1xf32>
    %248 = arith.divf %246, %247 : vector<8x1xf32>
    %249 = vector.broadcast %241 : vector<8x1xf32> to vector<8x32xf32>
    %250 = arith.subf %237, %249 : vector<8x32xf32>
    %cst_74 = arith.constant 9.99999974E-6 : f32
    %251 = vector.broadcast %cst_74 : f32 to vector<8x1xf32>
    %252 = arith.addf %248, %251 : vector<8x1xf32>
    %253 = math.rsqrt %252 : vector<8x1xf32>
    %254 = vector.broadcast %253 : vector<8x1xf32> to vector<8x32xf32>
    %255 = arith.mulf %250, %254 : vector<8x32xf32>
    %256 = vector.broadcast %1 : vector<1x32xf32> to vector<8x32xf32>
    %257 = arith.mulf %255, %256 : vector<8x32xf32>
    %258 = vector.broadcast %2 : vector<1x32xf32> to vector<8x32xf32>
    %259 = arith.addf %257, %258 : vector<8x32xf32>
    %cst_75 = arith.constant dense<0.000000e+00> : vector<8x128xf32>
    %260 = tpu.matmul %259, %9, %cst_75 {dimension_numbers = #tpu.dot_dimension_numbers<[1], [0], [0], [1], [0, 0, 1, 1], [], []>} : vector<8x32xf32>, vector<32x128xf32>, vector<8x128xf32> -> vector<8x128xf32>
    %261 = vector.broadcast %5 : vector<1x128xf32> to vector<8x128xf32>
    %262 = arith.addf %260, %261 : vector<8x128xf32>
    %cst_76 = arith.constant 5.000000e-01 : f32
    %263 = vector.broadcast %cst_76 : f32 to vector<8x128xf32>
    %264 = arith.mulf %263, %262 : vector<8x128xf32>
    %cst_77 = arith.constant 4.471500e-02 : f32
    %265 = vector.broadcast %cst_77 : f32 to vector<8x128xf32>
    %266 = arith.mulf %265, %262 : vector<8x128xf32>
    %267 = arith.mulf %266, %262 : vector<8x128xf32>
    %268 = arith.mulf %267, %262 : vector<8x128xf32>
    %269 = arith.addf %262, %268 : vector<8x128xf32>
    %cst_78 = arith.constant 0.797884583 : f32
    %270 = vector.broadcast %cst_78 : f32 to vector<8x128xf32>
    %271 = arith.mulf %270, %269 : vector<8x128xf32>
    %272 = math.tanh %271 : vector<8x128xf32>
    %cst_79 = arith.constant 1.000000e+00 : f32
    %273 = vector.broadcast %cst_79 : f32 to vector<8x128xf32>
    %274 = arith.addf %273, %272 : vector<8x128xf32>
    %275 = arith.mulf %264, %274 : vector<8x128xf32>
    %cst_80 = arith.constant dense<0.000000e+00> : vector<8x32xf32>
    %276 = tpu.matmul %275, %10, %cst_80 {dimension_numbers = #tpu.dot_dimension_numbers<[1], [0], [0], [1], [0, 0, 1, 1], [], []>} : vector<8x128xf32>, vector<128x32xf32>, vector<8x32xf32> -> vector<8x32xf32>
    %277 = vector.broadcast %4 : vector<1x32xf32> to vector<8x32xf32>
    %278 = arith.addf %276, %277 : vector<8x32xf32>
    %279 = arith.addf %278, %237 : vector<8x32xf32>
    %280 = vector.shape_cast %145 : vector<8x32xf32> to vector<8x1x32xf32>
    %281 = vector.shape_cast %279 : vector<8x32xf32> to vector<8x1x32xf32>
    %282 = tpu.concatenate %280, %281 in 1 : vector<8x1x32xf32>, vector<8x1x32xf32> -> vector<8x2x32xf32>
    %c0_81 = arith.constant 0 : index
    %c0_82 = arith.constant 0 : index
    %c0_83 = arith.constant 0 : index
    %283 = vector.load %arg7[%c0_81, %c0_82, %c0_83] : memref<8x2x32xf32, #tpu.memory_space<vmem>>, vector<8x2x32xf32>
    tpu.vector_store %arg7[%c0_81, %c0_82, %c0_83], %282 {strides = array<i32>} : memref<8x2x32xf32, #tpu.memory_space<vmem>>, vector<8x2x32xf32>,
    return
  }
}

</mosaic_0001>

<bundles_post_ra>
// kernel: encoder_block.1
= control target key start
LH: loop header
LB: loop body
LE: loop exit
PB: predicated region body
PF: predicated region fallthrough
CT: control target
= control target key end

     0   :  { %vm74_vm0 = vcmask 1041409   ;;  %vm77_vm1 = vcmask 1042434   ;;  %vm80_vm2 = vcmask 1043459   ;;  %s3891_s0 = inlined_call_operand.vmem [shape: f32[8,2,32], index: 0, kind: input, shape index: {}]   ;;  %s3892_s1 = inlined_call_operand.vmem [shape: f32[32,96], index: 1, kind: input, shape index: {}]   ;;  %s3893_s2 = inlined_call_operand.vmem [shape: f32[1,96], index: 2, kind: input, shape index: {}]   ;;  %s3894_s3 = inlined_call_operand.vmem [shape: f32[32,32], index: 3, kind: input, shape index: {}]   ;;  %s3895_s4 = inlined_call_operand.vmem [shape: f32[32,128], index: 4, kind: input, shape index: {}]   ;;  %s3896_s5 = inlined_call_operand.vmem [shape: f32[128,32], index: 5, kind: input, shape index: {}]   ;;  %s3897_s6 = inlined_call_operand.vmem [shape: f32[8,128], index: 6, kind: input, shape index: {}]   ;;  %s3898_s7 = inlined_call_operand.hbm [shape: f32[8,2,32], index: 7, kind: output, shape index: {}]  }
   0x1   :  { %v3166_v0 = vld [vmem:[%s3891_s0] sm:$0x3]  ;;  %v3171_v1 = vld [vmem:[%s3891_s0 + $0x2] sm:$0x3]  ;;  %v3176_v2 = vld [vmem:[%s3891_s0 + $0x4] sm:$0x3] }
   0x2   :  { %v3181_v3 = vld [vmem:[%s3891_s0 + $0x6] sm:$0x3]  ;;  %v3186_v4 = vld [vmem:[%s3891_s0 + $0x8] sm:$0x3]  ;;  %v3191_v5 = vld [vmem:[%s3891_s0 + $0xa] sm:$0x3] }
   0x3   :  { %v3196_v6 = vld [vmem:[%s3891_s0 + $0xc] sm:$0x3]  ;;  %v3201_v7 = vld [vmem:[%s3891_s0 + $0xe] sm:$0x3]  ;;  %v73_v8 = vrot.slane %v3171_v1, 7  ;;  %v76_v9 = vrot.slane %v3176_v2, 6 }
   0x4   :  { %v79_v10 = vrot.slane %v3181_v3, 5 }
   0x5   :  { %12 = vsyncpa [#allocation3], 0  ;;  %v75_v11 = vsel %vm74_vm0, %v73_v8, %v3166_v0  ;;  %v82_v12 = vrot.slane %v3186_v4, 4  ;;  %vm83_vm3 = vcmask 1044484   ;;  %v85_v13 = vrot.slane %v3191_v5, 3  ;;  %v28_v63 = vld [vmem:[%s3892_s1] sm:$0xff] }
   0x6   :  { %v78_v14 = vsel %vm77_vm1, %v76_v9, %v75_v11  ;;  %vm86_vm4 = vcmask 1045509   ;;  %v88_v15 = vrot.slane %v3196_v6, 2  ;;  %vm89_vm5 = vcmask 1046534   ;;  %v29_v11 = vld [vmem:[%s3892_s1 + $0x8] sm:$0xff]  ;;  %s3105_s28 = smov 120   ;;  %s3106_s29 = smov 96  }
   0x7   :  { %v81_v16 = vsel %vm80_vm2, %v79_v10, %v78_v14  ;;  %v91_v17 = vrot.slane %v3201_v7, 1  ;;  %vm92_vm6 = vcmask 1047559   ;;  %vm95_vm7 = vcmask 261120   ;;  %v30_v14 = vld [vmem:[%s3892_s1 + $0x10] sm:$0xff]  ;;  %s3107_s30 = smov 88   ;;  %s3108_s8 = smov 80  }
   0x8   :  { %v84_v18 = vsel %vm83_vm3, %v82_v12, %v81_v16  ;;  %v3102_v16 = vmov 0.0|0.0   ;;  %vm3103_vm8 = vmmov 0   ;;  %s3110_s9 = smov 72   ;;  %s3111_s10 = smov 104   ;;  %vm313_vm9 = vcmask 64512  }
   0x9   :  { %v87_v19 = vsel %vm86_vm4, %v85_v13, %v84_v18  ;;  %2918 = vmatprep.subr.bf16.mxu1 %v3102_v16  ;;  %v3294_v18 = vpack.c.bf16 %v29_v11, %v28_v63  ;;  %s3112_s11 = smov 64   ;;  %s3113_s12 = smov 48   ;;  %vm1253_vm10 = vcmask 253952   ;;  %vm1249_vm11 = vcmask 261121  }
   0xa   :  { %v90_v20 = vsel %vm89_vm5, %v88_v15, %v87_v19  ;;  %v31_v19 = vld [vmem:[%s3892_s1 + $0x18] sm:$0xff]  ;;  %s3114_s13 = smov 40   ;;  %s3115_s14 = smov 56   ;;  %vm983_vm12 = vcmask 130048   ;;  %vm985_vm13 = vcmask 195584   ;;  %vm2541_vm14 = vcmask 1040384  }
   0xb   :  { %v3232_v21 = vsel %vm92_vm6, %v91_v17, %v90_v20  ;;  %v3104_v20 = vmov 0.0   ;;  %2920 = vmatpush3.bf16.msra.mxu1 %v3294_v18  ;;  %s3116_s23 = smov 8   ;;  %s3117_s24 = smov 16   ;;  %vm2550_vm15 = vcmask 254976  }
   0xc   :  { %v96_v22 = vsel %vm95_vm7, %v3232_v21, 0.0  ;;  %2710 = vmatprep.mubr.msk.f32.mxu1 %vm3103_vm8, %v3104_v20  ;;  %2723 = vmatprep.subr.mxu0 %v3104_v20  ;;  %s3118_s1 = smov 24  }
   0xd   :  { %97 = vadd.xlane.f32.xlu0 %v96_v22  ;;  %2725 = vmatprep.mubr.msk.f32.mxu0 %vm3103_vm8, %v3104_v20  ;;  %v3305_v22 = vpack.c.bf16 %v31_v19, %v30_v14 }
   0xe   :  { %2921 = vmatprep.subr.bf16.mxu1 %v3102_v16 }
   0xf   :  { %2923 = vmatpush3.bf16.msra.mxu1 %v3305_v22 }
  0x10   :  { %2713 = vmatprep.subr.mxu1 %v3104_v20 }
  0x9a   :  { %v98_v23 = vpop.xlane.xlu0 %97 }
  0x9b   :  { %v100_v24 = vmul.f32 0.03125, %v98_v23 }
  0x9d   :  { %v102_v25 = vrot.slane %v100_v24, 1  ;;  %v103_v26 = vrot.slane %v100_v24, 2  ;;  %v104_v27 = vrot.slane %v100_v24, 3  ;;  %v105_v28 = vrot.slane %v100_v24, 4 }
  0x9e   :  { %v106_v29 = vrot.slane %v100_v24, 5  ;;  %v107_v30 = vrot.slane %v100_v24, 6  ;;  %v108_v31 = vrot.slane %v100_v24, 7  ;;  %v3237_v32 = vsub.f32 %v3166_v0, %v100_v24 }
  0x9f   :  { %v3240_v33 = vsub.f32 %v3171_v1, %v102_v25  ;;  %v3243_v34 = vsub.f32 %v3176_v2, %v103_v26  ;;  %v3246_v35 = vsub.f32 %v3181_v3, %v104_v27  ;;  %v3249_v36 = vsub.f32 %v3186_v4, %v105_v28 }
  0xa0   :  { %v3252_v37 = vsub.f32 %v3191_v5, %v106_v29  ;;  %v3255_v38 = vsub.f32 %v3196_v6, %v107_v30  ;;  %v3258_v39 = vsub.f32 %v3201_v7, %v108_v31  ;;  %v125_v44 = vmul.f32 %v3237_v32, %v3237_v32  ;;  %v3319_v30 = vld [vmem:[%s3897_s6] sm:$0xff] }
  0xa1   :  { %v126_v40 = vmul.f32 %v3240_v33, %v3240_v33  ;;  %v127_v41 = vmul.f32 %v3243_v34, %v3243_v34  ;;  %v128_v42 = vmul.f32 %v3246_v35, %v3246_v35  ;;  %v129_v43 = vmul.f32 %v3249_v36, %v3249_v36 }
  0xa2   :  { %v130_v45 = vmul.f32 %v3252_v37, %v3252_v37  ;;  %v131_v48 = vmul.f32 %v3255_v38, %v3255_v38  ;;  %v132_v49 = vmul.f32 %v3258_v39, %v3258_v39  ;;  %v186_v26 = vlaneseq }
  0xa3   :  { %v141_v46 = vrot.slane %v126_v40, 7  ;;  %v143_v47 = vrot.slane %v127_v41, 6  ;;  %v145_v51 = vrot.slane %v128_v42, 5  ;;  %v147_v53 = vrot.slane %v129_v43, 4 }
  0xa4   :  { %v149_v55 = vrot.slane %v130_v45, 3  ;;  %v151_v57 = vrot.slane %v131_v48, 2  ;;  %v153_v59 = vrot.slane %v132_v49, 1  ;;  %v3310_v27 = vshrl.u32 %v186_v26, 7 }
  0xa5   :  { %v142_v50 = vsel %vm74_vm0, %v141_v46, %v125_v44 }
  0xa6   :  { %v144_v52 = vsel %vm77_vm1, %v143_v47, %v142_v50  ;;  %v3313_v28 = vsub.s32 0, %v3310_v27  ;;  %v200_v29 = vsub.s32 1, %v3310_v27 }
  0xa7   :  { %v146_v54 = vsel %vm80_vm2, %v145_v51, %v144_v52 }
  0xa8   :  { %v148_v56 = vsel %vm83_vm3, %v147_v53, %v146_v54  ;;  %v3323_v40 = vrot.slane %v3319_v30, %v3313_v28  ;;  %v3326_v41 = vrot.slane %v3319_v30, %v200_v29 }
  0xa9   :  { %v150_v58 = vsel %vm86_vm4, %v149_v55, %v148_v56 }
  0xaa   :  { %v152_v60 = vsel %vm89_vm5, %v151_v57, %v150_v58 }
  0xab   :  { %v154_v61 = vsel %vm92_vm6, %v153_v59, %v152_v60 }
  0xac   :  { %v156_v62 = vsel %vm95_vm7, %v154_v61, 0.0 }
  0xad   :  { %157 = vadd.xlane.f32.xlu0 %v156_v62 }
 0x13a   :  { %v158_v23 = vpop.xlane.xlu0 %157 }
 0x13b   :  { %v159_v24 = vmul.f32 0.03125, %v158_v23 }
 0x13d   :  { %v160_v25 = vadd.f32 1e-05, %v159_v24 }
 0x13f   :  { %3023 = vrsqrt.f32 %v160_v25 }
 0x149   :  { %v3024_v31 = vpop.eup %3023 }
 0x14a   :  { %v163_v42 = vrot.slane %v3024_v31, 1  ;;  %v164_v43 = vrot.slane %v3024_v31, 2  ;;  %v165_v44 = vrot.slane %v3024_v31, 3  ;;  %v166_v45 = vrot.slane %v3024_v31, 4 }
 0x14b   :  { %v167_v46 = vrot.slane %v3024_v31, 5  ;;  %v168_v47 = vrot.slane %v3024_v31, 6  ;;  %v169_v48 = vrot.slane %v3024_v31, 7  ;;  %v178_v49 = vmul.f32 %v3024_v31, %v3237_v32 }
 0x14c   :  { %v179_v50 = vmul.f32 %v163_v42, %v3240_v33  ;;  %v180_v51 = vmul.f32 %v164_v43, %v3243_v34  ;;  %v181_v52 = vmul.f32 %v165_v44, %v3246_v35  ;;  %v182_v53 = vmul.f32 %v166_v45, %v3249_v36 }
 0x14d   :  { %v183_v54 = vmul.f32 %v167_v46, %v3252_v37  ;;  %v184_v55 = vmul.f32 %v168_v47, %v3255_v38  ;;  %v185_v56 = vmul.f32 %v169_v48, %v3258_v39  ;;  %v190_v57 = vmul.f32 %v3323_v40, %v178_v49  ;;  %v3365_v48 = vld [vmem:[%s3893_s2] ss:$0 sm:$0xff]  ;;  %s3109_s2 = smov 112  }
 0x14e   :  { %v191_v58 = vmul.f32 %v3323_v40, %v179_v50  ;;  %v192_v32 = vmul.f32 %v3323_v40, %v180_v51  ;;  %v193_v33 = vmul.f32 %v3323_v40, %v181_v52  ;;  %v194_v34 = vmul.f32 %v3323_v40, %v182_v53 }
 0x14f   :  { %v195_v35 = vmul.f32 %v3323_v40, %v183_v54  ;;  %v196_v36 = vmul.f32 %v3323_v40, %v184_v55  ;;  %v197_v37 = vmul.f32 %v3323_v40, %v185_v56  ;;  %v202_v61 = vadd.f32 %v3326_v41, %v190_v57 }
 0x150   :  { %v203_v38 = vadd.f32 %v3326_v41, %v191_v58  ;;  %v204_v39 = vadd.f32 %v3326_v41, %v192_v32  ;;  %v205_v59 = vadd.f32 %v3326_v41, %v193_v33  ;;  %v206_v60 = vadd.f32 %v3326_v41, %v194_v34 }
 0x151   :  { %v207_v62 = vadd.f32 %v3326_v41, %v195_v35  ;;  %v208_v14 = vadd.f32 %v3326_v41, %v196_v36  ;;  %v209_v19 = vadd.f32 %v3326_v41, %v197_v37 }
 0x152   :  { %v224_v63 = vrot.slane %v203_v38, 7  ;;  %v226_v11 = vrot.slane %v204_v39, 6  ;;  %v228_v24 = vrot.slane %v205_v59, 5  ;;  %v230_v26 = vrot.slane %v206_v60, 4 }
 0x153   :  { %v232_v31 = vrot.slane %v207_v62, 3  ;;  %v234_v43 = vrot.slane %v208_v14, 2  ;;  %v236_v45 = vrot.slane %v209_v19, 1 }
 0x154   :  { %v225_v23 = vsel %vm74_vm0, %v224_v63, %v202_v61 }
 0x155   :  { %v227_v25 = vsel %vm77_vm1, %v226_v11, %v225_v23 }
 0x156   :  { %v229_v29 = vsel %vm80_vm2, %v228_v24, %v227_v25 }
 0x157   :  { %v231_v42 = vsel %vm83_vm3, %v230_v26, %v229_v29 }
 0x158   :  { %v233_v44 = vsel %vm86_vm4, %v232_v31, %v231_v42 }
 0x159   :  { %v235_v46 = vsel %vm89_vm5, %v234_v43, %v233_v44 }
 0x15a   :  { %v237_v47 = vsel %vm92_vm6, %v236_v45, %v235_v46 }
 0x15b   :  { %2711 = vmatmul.mubr.msk.f32.vlgmr.msra.gmra.mrb[0].mxu1 %vm95_vm7, %v237_v47 }
 0x15c   :  { %2715 = vmatprep.mubr.msk.f32.mxu1 %vm3103_vm8, %v3104_v20 }
 0x22e   :  { %v306_v49 = vpop.f32.mrb[0].mxu1 }
 0x22f   :  { %v3368_v50 = vadd.f32 %v3365_v48, %v306_v49  ;;  %v2712_v51 = vpop.f32.mrb[1].mxu1 }
 0x231   :  { %475 = vrot.lane.b32.xlu0 %v3368_v50, %s3105_s28  ;;  %311 = vrot.lane.b32.xlu1 %v3368_v50, %s3106_s29 }
 0x235   :  { %477 = vrot.lane.b32.xlu1 %v3368_v50, %s3107_s30 }
 0x239   :  { %642 = vrot.lane.b32.xlu1 %v3368_v50, %s3108_s8 }
 0x23d   :  { %640 = vrot.lane.b32.xlu1 %v3368_v50, %s3109_s2 }
 0x241   :  { %807 = vrot.lane.b32.xlu1 %v3368_v50, %s3110_s9 }
 0x245   :  { %805 = vrot.lane.b32.xlu1 %v3368_v50, %s3111_s10 }
 0x2a3   :  { %v312_v52 = vpop.permute.xlu1 %311  ;;  %v476_v54 = vpop.permute.xlu0 %475 }
 0x2a4   :  { %2714 = vmatpush3.xpose.msk.msra.mxu1 %vm313_vm9, %v312_v52 }
 0x2a5   :  { %2718 = vmatprep.subr.mxu1 %v3104_v20 }
 0x2a7   :  { %2716 = vmatmul.mubr.msk.f32.vlgmr.msra.gmra.mrb[2].mxu1 %vm313_vm9, %v3368_v50  ;;  %v478_v53 = vpop.permute.xlu1 %477 }
 0x2a8   :  { %2724 = vmatpush3.xpose.msk.msra.mxu0 %vm313_vm9, %v478_v53  ;;  %2720 = vmatprep.mubr.msk.f32.mxu1 %vm3103_vm8, %v3104_v20 }
 0x2a9   :  { %2733 = vmatprep.subr.mxu0 %v3104_v20 }
 0x2ab   :  { %2726 = vmatmul.mubr.msk.f32.vlgmr.msra.gmra.mrb[0].mxu0 %vm313_vm9, %v476_v54  ;;  %v643_v55 = vpop.permute.xlu1 %642 }
 0x2ac   :  { %2734 = vmatpush3.xpose.msk.msra.mxu0 %vm313_vm9, %v643_v55  ;;  %2735 = vmatprep.mubr.msk.f32.mxu0 %vm3103_vm8, %v3104_v20 }
 0x2ad   :  { %2743 = vmatprep.subr.mxu0 %v3104_v20 }
 0x2af   :  { %v641_v56 = vpop.permute.xlu1 %640 }
 0x2b0   :  { %2736 = vmatmul.mubr.msk.f32.vlgmr.msra.gmra.mrb[2].mxu0 %vm313_vm9, %v641_v56 }
 0x2b1   :  { %2745 = vmatprep.mubr.msk.f32.mxu0 %vm3103_vm8, %v3104_v20 }
 0x2b3   :  { %v808_v57 = vpop.permute.xlu1 %807 }
 0x2b4   :  { %2744 = vmatpush3.xpose.msk.msra.mxu0 %vm313_vm9, %v808_v57 }
 0x2b5   :  { %2936 = vmatprep.subr.bf16.mxu0 %v3102_v16 }
 0x2b7   :  { %v806_v58 = vpop.permute.xlu1 %805 }
 0x2b8   :  { %2746 = vmatmul.mubr.msk.f32.vlgmr.msra.gmra.mrb[4].mxu0 %vm313_vm9, %v806_v58 }
 0x2b9   :  { %2807 = vmatprep.mubr.msk.f32.mxu0 %vm3103_vm8, %v3104_v20 }
 0x37a   :  { %v384_v32 = vpop.f32.mrb[2].mxu1 }
 0x37b   :  { %v2717_v33 = vpop.f32.mrb[3].mxu1  ;;  %v388_v34 = vsel %vm313_vm9, %v384_v32, -inf }
 0x37c   :  { %389 = vmax.xlane.f32.xlu1 %v388_v34 }
 0x37e   :  { %v549_v35 = vpop.f32.mrb[0].mxu0 }
 0x37f   :  { %v2727_v36 = vpop.f32.mrb[1].mxu0  ;;  %v553_v37 = vsel %vm313_vm9, %v549_v35, -inf }
 0x380   :  { %554 = vmax.xlane.f32.xlu0 %v553_v37 }
 0x383   :  { %v714_v38 = vpop.f32.mrb[2].mxu0 }
 0x384   :  { %v2737_v39 = vpop.f32.mrb[3].mxu0  ;;  %v718_v59 = vsel %vm313_vm9, %v714_v38, -inf }
 0x385   :  { %719 = vmax.xlane.f32.xlu1 %v718_v59 }
 0x38b   :  { %v879_v60 = vpop.f32.mrb[4].mxu0 }
 0x38c   :  { %v2747_v61 = vpop.f32.mrb[5].mxu0  ;;  %v883_v62 = vsel %vm313_vm9, %v879_v60, -inf }
 0x38d   :  { %884 = vmax.xlane.f32.xlu0 %v883_v62  ;;  %v33_v61 = vld [vmem:[%s3894_s3] sm:$0xff]  ;;  %v34_v62 = vld [vmem:[%s3894_s3 + $0x8] sm:$0xff] }
 0x396   :  { %399 = vrot.lane.b32.xlu1 %v3368_v50, %s3112_s11 }
 0x409   :  { %v390_v63 = vpop.xlane.xlu1 %389 }
 0x40a   :  { %v391_v11 = vsub.f32 %v384_v32, %v390_v63  ;;  %v3443_v63 = vpack.c.bf16 %v34_v62, %v33_v61 }
 0x40c   :  { %v392_v14 = vmul.f32 1.442695, %v391_v11 }
 0x40d   :  { %v555_v19 = vpop.xlane.xlu0 %554 }
 0x40e   :  { %3025 = vpow2.f32 %v392_v14  ;;  %v556_v23 = vsub.f32 %v549_v35, %v555_v19  ;;  %v35_v19 = vld [vmem:[%s3894_s3 + $0x10] sm:$0xff] }
 0x410   :  { %v557_v24 = vmul.f32 1.442695, %v556_v23  ;;  %v36_v23 = vld [vmem:[%s3894_s3 + $0x18] sm:$0xff] }
 0x412   :  { %3027 = vpow2.f32 %v557_v24  ;;  %v720_v25 = vpop.xlane.xlu1 %719  ;;  %v3453_v24 = vpack.c.bf16 %v36_v23, %v35_v19 }
 0x413   :  { %v721_v26 = vsub.f32 %v714_v38, %v720_v25 }
 0x415   :  { %v722_v29 = vmul.f32 1.442695, %v721_v26 }
 0x416   :  { %v400_v31 = vpop.permute.xlu1 %399 }
 0x417   :  { %3029 = vpow2.f32 %v722_v29  ;;  %2719 = vmatpush3.msra.mxu1 %v400_v31 }
 0x418   :  { %v3026_v42 = vpop.eup %3025  ;;  %2728 = vmatprep.subr.mxu1 %v3104_v20 }
 0x419   :  { %v394_v43 = vsel %vm313_vm9, %v3026_v42, 0.0 }
 0x41a   :  { %v885_v44 = vpop.xlane.xlu0 %884  ;;  %395 = vadd.xlane.f32.xlu1 %v394_v43 }
 0x41b   :  { %v886_v45 = vsub.f32 %v879_v60, %v885_v44  ;;  %v1241_v44 = vsel %vm77_vm1, %v73_v8, %v3166_v0 }
 0x41c   :  { %v3028_v46 = vpop.eup %3027 }
 0x41d   :  { %v887_v47 = vmul.f32 1.442695, %v886_v45  ;;  %v559_v49 = vsel %vm313_vm9, %v3028_v46, 0.0  ;;  %v1242_v45 = vsel %vm80_vm2, %v76_v9, %v1241_v44  ;;  %v1254_v9 = vsel %vm1253_vm10, %v91_v17, 0.0 }
 0x41e   :  { %560 = vadd.xlane.f32.xlu0 %v559_v49 }
 0x41f   :  { %3031 = vpow2.f32 %v887_v47 }
 0x421   :  { %v3030_v51 = vpop.eup %3029 }
 0x422   :  { %v724_v52 = vsel %vm313_vm9, %v3030_v51, 0.0 }
 0x423   :  { %725 = vadd.xlane.f32.xlu1 %v724_v52 }
 0x429   :  { %v3032_v53 = vpop.eup %3031 }
 0x42a   :  { %v889_v54 = vsel %vm313_vm9, %v3032_v53, 0.0 }
 0x42b   :  { %890 = vadd.xlane.f32.xlu0 %v889_v54 }
 0x434   :  { %729 = vrot.lane.b32.xlu1 %v3368_v50, %s3113_s12 }
 0x438   :  { %894 = vrot.lane.b32.xlu1 %v3368_v50, %s3114_s13 }
 0x441   :  { %564 = vrot.lane.b32.xlu0 %v3368_v50, %s3115_s14 }
 0x4a7   :  { %v396_v55 = vpop.xlane.xlu1 %395 }
 0x4a8   :  { %3033 = vrcp.f32 %v396_v55 }
 0x4ab   :  { %v561_v56 = vpop.xlane.xlu0 %560 }
 0x4ac   :  { %3035 = vrcp.f32 %v561_v56 }
 0x4b0   :  { %v726_v57 = vpop.xlane.xlu1 %725 }
 0x4b1   :  { %3037 = vrcp.f32 %v726_v57 }
 0x4b2   :  { %v3034_v58 = vpop.eup %3033 }
 0x4b3   :  { %v398_v32 = vmul.f32 %v3034_v58, %v3026_v42 }
 0x4b4   :  { %v730_v36 = vpop.permute.xlu1 %729 }
 0x4b5   :  { %2721 = vmatmul.mubr.msk.f32.vlgmr.msra.gmra.mrb[4].mxu1 %vm313_vm9, %v398_v32 }
 0x4b6   :  { %2730 = vmatprep.mubr.msk.f32.mxu1 %vm3103_vm8, %v3104_v20  ;;  %v3036_v34 = vpop.eup %3035 }
 0x4b7   :  { %v563_v35 = vmul.f32 %v3036_v34, %v3028_v46  ;;  %v1243_v46 = vsel %vm83_vm3, %v79_v10, %v1242_v45 }
 0x4b8   :  { %v891_v33 = vpop.xlane.xlu0 %890  ;;  %v895_v39 = vpop.permute.xlu1 %894  ;;  %v1244_v47 = vsel %vm86_vm4, %v82_v12, %v1243_v46 }
 0x4b9   :  { %3039 = vrcp.f32 %v891_v33  ;;  %v1245_v49 = vsel %vm89_vm5, %v85_v13, %v1244_v47 }
 0x4ba   :  { %v1246_v8 = vsel %vm92_vm6, %v88_v15, %v1245_v49 }
 0x4bb   :  { %v3038_v50 = vpop.eup %3037  ;;  %v1250_v10 = vsel %vm1249_vm11, %v1246_v8, 0.0  ;;  %v989_v8 = vsub.s32 2, %v3310_v27 }
 0x4bc   :  { %v565_v37 = vpop.permute.xlu0 %564  ;;  %v728_v38 = vmul.f32 %v3038_v50, %v3030_v51 }
 0x4bd   :  { %2729 = vmatpush3.msra.mxu1 %v565_v37 }
 0x4be   :  { %2731 = vmatmul.mubr.msk.f32.vlgmr.msra.gmra.mrb[6].mxu1 %vm313_vm9, %v563_v35  ;;  %2738 = vmatprep.subr.mxu1 %v3104_v20 }
 0x4bf   :  { %2739 = vmatpush3.msra.mxu1 %v730_v36  ;;  %2740 = vmatprep.mubr.msk.f32.mxu1 %vm3103_vm8, %v3104_v20 }
 0x4c0   :  { %2748 = vmatprep.subr.mxu1 %v3104_v20 }
 0x4c2   :  { %2741 = vmatmul.mubr.msk.f32.vlgmr.msra.gmra.mrb[8].mxu1 %vm313_vm9, %v728_v38 }
 0x4c3   :  { %v3040_v59 = vpop.eup %3039  ;;  %2749 = vmatpush3.msra.mxu1 %v895_v39  ;;  %2750 = vmatprep.mubr.msk.f32.mxu1 %vm3103_vm8, %v3104_v20 }
 0x4c4   :  { %v893_v60 = vmul.f32 %v3040_v59, %v3032_v53  ;;  %2924 = vmatprep.subr.bf16.mxu1 %v3102_v16 }
 0x4c6   :  { %2751 = vmatmul.mubr.msk.f32.vlgmr.msra.gmra.mrb[10].mxu1 %vm313_vm9, %v893_v60 }
 0x4c7   :  { %2761 = vmatprep.mubr.msk.f32.mxu1 %vm3103_vm8, %v3104_v20  ;;  %2926 = vmatpush3.bf16.msra.mxu1 %v3443_v63 }
 0x4c8   :  { %2927 = vmatprep.subr.bf16.mxu1 %v3102_v16 }
 0x4cb   :  { %2929 = vmatpush3.bf16.msra.mxu1 %v3453_v24 }
 0x4cc   :  { %2930 = vmatprep.subr.bf16.mxu1 %v3102_v16 }
 0x588   :  { %v471_v11 = vpop.f32.mrb[4].mxu1 }
 0x589   :  { %v2722_v14 = vpop.f32.mrb[5].mxu1 }
 0x591   :  { %v636_v25 = vpop.f32.mrb[6].mxu1 }
 0x592   :  { %971 = vrot.lane.b32.xlu0 %v636_v25, %s3116_s23  ;;  %v2732_v26 = vpop.f32.mrb[7].mxu1 }
 0x595   :  { %v801_v29 = vpop.f32.mrb[8].mxu1 }
 0x596   :  { %975 = vrot.lane.b32.xlu1 %v801_v29, %s3117_s24  ;;  %v2742_v31 = vpop.f32.mrb[9].mxu1 }
 0x599   :  { %v966_v42 = vpop.f32.mrb[10].mxu1 }
 0x59a   :  { %979 = vrot.lane.b32.xlu0 %v966_v42, %s3118_s1  ;;  %v2752_v43 = vpop.f32.mrb[11].mxu1 }
 0x5b9   :  { %1255 = vadd.xlane.f32.xlu0 %v1254_v9  ;;  %v3539_v9 = vrot.slane %v3319_v30, %v989_v8 }
 0x5ba   :  { %1251 = vadd.xlane.f32.xlu1 %v1250_v10 }
 0x604   :  { %v972_v51 = vpop.permute.xlu0 %971 }
 0x605   :  { %v982_v13 = vsel %vm313_vm9, %v471_v11, %v972_v51 }
 0x608   :  { %v976_v12 = vpop.permute.xlu1 %975 }
 0x609   :  { %v984_v52 = vsel %vm983_vm12, %v982_v13, %v976_v12 }
 0x60c   :  { %v980_v53 = vpop.permute.xlu0 %979 }
 0x60d   :  { %v986_v15 = vsel %vm985_vm13, %v984_v52, %v980_v53 }
 0x60e   :  { %2762 = vmatmul.mubr.msk.f32.vlgmr.msra.gmra.mrb[12].mxu1 %vm95_vm7, %v986_v15 }
 0x60f   :  { %2772 = vmatprep.mubr.msk.f32.mxu1 %vm3103_vm8, %v3104_v20 }
 0x646   :  { %v1256_v17 = vpop.xlane.xlu0 %1255 }
 0x647   :  { %v1252_v54 = vpop.xlane.xlu1 %1251  ;;  %v1258_v55 = vmul.f32 0.03125, %v1256_v17 }
 0x648   :  { %v1257_v56 = vmul.f32 0.03125, %v1252_v54 }
 0x649   :  { %v1267_v57 = vrot.slane %v1258_v55, 7 }
 0x64a   :  { %v1261_v58 = vrot.slane %v1257_v56, 1  ;;  %v1262_v32 = vrot.slane %v1257_v56, 2  ;;  %v1263_v33 = vrot.slane %v1257_v56, 3  ;;  %v1264_v34 = vrot.slane %v1257_v56, 4 }
 0x64b   :  { %v1265_v35 = vrot.slane %v1257_v56, 5  ;;  %v1266_v36 = vrot.slane %v1257_v56, 6  ;;  %v3490_v37 = vsub.f32 %v3166_v0, %v1257_v56  ;;  %v3505_v60 = vsub.f32 %v3201_v7, %v1267_v57  ;;  %v38_v56 = vld [vmem:[%s3895_s4 + $0x8] sm:$0xff] }
 0x64c   :  { %v3493_v50 = vsub.f32 %v3171_v1, %v1261_v58  ;;  %v3496_v38 = vsub.f32 %v3176_v2, %v1262_v32  ;;  %v3499_v39 = vsub.f32 %v3181_v3, %v1263_v33  ;;  %v3502_v59 = vsub.f32 %v3186_v4, %v1264_v34  ;;  %v39_v58 = vld [vmem:[%s3895_s4 + $0x10] sm:$0xff]  ;;  %v40_v32 = vld [vmem:[%s3895_s4 + $0x18] sm:$0xff]  ;;  %v41_v34 = vld [vmem:[%s3896_s5] sm:$0xff] }
 0x64d   :  { %v3508_v61 = vsub.f32 %v3191_v5, %v1265_v35  ;;  %v3511_v0 = vsub.f32 %v3196_v6, %v1266_v36  ;;  %v1284_v1 = vmul.f32 %v3490_v37, %v3490_v37  ;;  %v1291_v26 = vmul.f32 %v3505_v60, %v3505_v60  ;;  %v42_v35 = vld [vmem:[%s3896_s5 + $0x8] sm:$0xff] }
 0x64e   :  { %v1285_v2 = vmul.f32 %v3493_v50, %v3493_v50  ;;  %v1286_v3 = vmul.f32 %v3496_v38, %v3496_v38  ;;  %v1287_v4 = vmul.f32 %v3499_v39, %v3499_v39  ;;  %v1288_v7 = vmul.f32 %v3502_v59, %v3502_v59 }
 0x64f   :  { %v1289_v5 = vmul.f32 %v3508_v61, %v3508_v61  ;;  %v1290_v6 = vmul.f32 %v3511_v0, %v3511_v0  ;;  %v1312_v45 = vrot.slane %v1291_v26, 1  ;;  %v3569_v33 = vpack.c.bf16 %v40_v32, %v39_v58 }
 0x650   :  { %v1300_v62 = vrot.slane %v1285_v2, 7  ;;  %v1302_v11 = vrot.slane %v1286_v3, 6  ;;  %v1304_v14 = vrot.slane %v1287_v4, 5  ;;  %v1306_v19 = vrot.slane %v1288_v7, 4 }
 0x651   :  { %v1308_v25 = vrot.slane %v1289_v5, 3  ;;  %v1310_v31 = vrot.slane %v1290_v6, 2  ;;  %v1318_v49 = vsel %vm1253_vm10, %v1312_v45, 0.0  ;;  %v3579_v36 = vpack.c.bf16 %v42_v35, %v41_v34 }
 0x652   :  { %v1301_v23 = vsel %vm77_vm1, %v1300_v62, %v1284_v1 }
 0x653   :  { %v1303_v29 = vsel %vm80_vm2, %v1302_v11, %v1301_v23  ;;  %2938 = vmatpush3.bf16.msra.mxu0 %v3579_v36 }
 0x654   :  { %v1305_v42 = vsel %vm83_vm3, %v1304_v14, %v1303_v29  ;;  %2939 = vmatprep.subr.bf16.mxu0 %v3102_v16 }
 0x655   :  { %v1307_v43 = vsel %vm86_vm4, %v1306_v19, %v1305_v42 }
 0x656   :  { %v1309_v44 = vsel %vm89_vm5, %v1308_v25, %v1307_v43 }
 0x657   :  { %v1311_v46 = vsel %vm92_vm6, %v1310_v31, %v1309_v44 }
 0x658   :  { %v1315_v47 = vsel %vm1249_vm11, %v1311_v46, 0.0 }
 0x659   :  { %1316 = vadd.xlane.f32.xlu1 %v1315_v47 }
 0x65d   :  { %1319 = vadd.xlane.f32.xlu1 %v1318_v49 }
 0x6e1   :  { %v1060_v10 = vpop.f32.mrb[12].mxu1 }
 0x6e2   :  { %v1061_v51 = vadd.f32 %v1060_v10, %v3539_v9  ;;  %v2763_v12 = vpop.f32.mrb[13].mxu1 }
 0x6e4   :  { %v3543_v13 = vadd.f32 %v1061_v51, %v3232_v21  ;;  %v37_v21 = vld [vmem:[%s3895_s4] sm:$0xff] }
 0x6e5   :  { %v3559_v57 = vpack.c.bf16 %v38_v56, %v37_v21 }
 0x6e6   :  { %v1065_v52 = vsel %vm95_vm7, %v3543_v13, 0.0  ;;  %v1317_v1 = vpop.xlane.xlu1 %1316 }
 0x6e7   :  { %1066 = vadd.xlane.f32.xlu0 %v1065_v52  ;;  %2932 = vmatpush3.bf16.msra.mxu1 %v3559_v57  ;;  %v1321_v2 = vmul.f32 0.03125, %v1317_v1 }
 0x6e8   :  { %2933 = vmatprep.subr.bf16.mxu1 %v3102_v16 }
 0x6e9   :  { %v1323_v3 = vadd.f32 1e-05, %v1321_v2 }
 0x6ea   :  { %v1320_v4 = vpop.xlane.xlu1 %1319 }
 0x6eb   :  { %2935 = vmatpush3.bf16.msra.mxu1 %v3569_v33  ;;  %3041 = vrsqrt.f32 %v1323_v3  ;;  %v1322_v7 = vmul.f32 0.03125, %v1320_v4 }
 0x6ec   :  { %2960 = vmatprep.subr.bf16.mxu1 %v3102_v16 }
 0x6ed   :  { %v1324_v6 = vadd.f32 1e-05, %v1322_v7 }
 0x6ef   :  { %3043 = vrsqrt.f32 %v1324_v6 }
 0x6f5   :  { %v3042_v5 = vpop.eup %3041 }
 0x6f6   :  { %v1330_v62 = vrot.slane %v3042_v5, 2  ;;  %v1329_v11 = vrot.slane %v3042_v5, 1  ;;  %v1344_v14 = vmul.f32 %v3042_v5, %v3490_v37  ;;  %v1331_v19 = vrot.slane %v3042_v5, 3 }
 0x6f7   :  { %v1332_v31 = vrot.slane %v3042_v5, 4  ;;  %v1333_v46 = vrot.slane %v3042_v5, 5  ;;  %v1334_v8 = vrot.slane %v3042_v5, 6 }
 0x6f8   :  { %v1346_v23 = vmul.f32 %v1330_v62, %v3496_v38  ;;  %v1345_v25 = vmul.f32 %v1329_v11, %v3493_v50  ;;  %v1352_v26 = vmul.f32 %v1344_v14, %v3323_v40  ;;  %v1347_v43 = vmul.f32 %v1331_v19, %v3499_v39 }
 0x6f9   :  { %v1348_v49 = vmul.f32 %v1332_v31, %v3502_v59  ;;  %v3044_v38 = vpop.eup %3043  ;;  %v1349_v51 = vmul.f32 %v1333_v46, %v3508_v61  ;;  %v46_v31 = vld [vmem:[%s3896_s5 + $0x28] sm:$0xff]  ;;  %v49_v46 = vld [vmem:[%s3896_s5 + $0x40] sm:$0xff] }
 0x6fa   :  { %v1354_v44 = vmul.f32 %v1346_v23, %v3323_v40  ;;  %v1353_v47 = vmul.f32 %v1345_v25, %v3323_v40  ;;  %v1360_v37 = vadd.f32 %v1352_v26, %v3326_v41  ;;  %v1355_v50 = vmul.f32 %v1347_v43, %v3323_v40  ;;  %v44_v26 = vld [vmem:[%s3896_s5 + $0x18] sm:$0xff]  ;;  %v47_v43 = vld [vmem:[%s3896_s5 + $0x30] sm:$0xff] }
 0x6fb   :  { %v1356_v52 = vmul.f32 %v1348_v49, %v3323_v40  ;;  %v51_v49 = vld [vmem:[%s3896_s5 + $0x50] sm:$0xff] }
 0x6fc   :  { %v1362_v10 = vadd.f32 %v1354_v44, %v3326_v41  ;;  %v1361_v39 = vadd.f32 %v1353_v47, %v3326_v41  ;;  %v1376_v12 = vrot.slane %v1360_v37, 1  ;;  %v48_v44 = vld [vmem:[%s3896_s5 + $0x38] sm:$0xff]  ;;  %v50_v47 = vld [vmem:[%s3896_s5 + $0x48] sm:$0xff] }
 0x6fd   :  { %v1364_v56 = vadd.f32 %v1356_v52, %v3326_v41  ;;  %v3663_v37 = vpack.c.bf16 %v50_v47, %v49_v46 }
 0x6fe   :  { %v1378_v59 = vrot.slane %v1362_v10, 7  ;;  %v1377_v21 = vsel %vm74_vm0, %v1361_v39, %v1376_v12  ;;  %v54_v10 = vld [vmem:[%s3896_s5 + $0x68] sm:$0xff]  ;;  %v56_v12 = vld [vmem:[%s3896_s5 + $0x78] sm:$0xff] }
 0x700   :  { %v1379_v34 = vsel %vm77_vm1, %v1378_v59, %v1377_v21 }
 0x774   :  { %v1067_v53 = vpop.xlane.xlu0 %1066 }
 0x775   :  { %v1068_v15 = vmul.f32 0.03125, %v1067_v53  ;;  %v1335_v53 = vrot.slane %v3044_v38, 7 }
 0x777   :  { %v3548_v17 = vsub.f32 %v3543_v13, %v1068_v15  ;;  %v1363_v15 = vadd.f32 %v1355_v50, %v3326_v41  ;;  %v1351_v58 = vmul.f32 %v1335_v53, %v3505_v60  ;;  %v52_v50 = vld [vmem:[%s3896_s5 + $0x58] sm:$0xff]  ;;  %v1082_v53 = vsub.s32 4, %v3310_v27 }
 0x778   :  { %v3673_v38 = vpack.c.bf16 %v52_v50, %v51_v49 }
 0x779   :  { %v1070_v54 = vmul.f32 %v3548_v17, %v3548_v17  ;;  %v1380_v61 = vrot.slane %v1363_v15, 6  ;;  %v1359_v3 = vmul.f32 %v1351_v58, %v3323_v40  ;;  %v3699_v15 = vrot.slane %v3319_v30, %v1082_v53 }
 0x77b   :  { %v1071_v55 = vsel %vm95_vm7, %v1070_v54, 0.0  ;;  %v1350_v54 = vmul.f32 %v1334_v8, %v3511_v0  ;;  %v1382_v0 = vrot.slane %v1364_v56, 5  ;;  %v1381_v4 = vsel %vm80_vm2, %v1380_v61, %v1379_v34  ;;  %v53_v8 = vld [vmem:[%s3896_s5 + $0x60] sm:$0xff] }
 0x77c   :  { %1072 = vadd.xlane.f32.xlu0 %v1071_v55  ;;  %v1357_v55 = vmul.f32 %v1349_v51, %v3323_v40  ;;  %v1367_v11 = vadd.f32 %v1359_v3, %v3326_v41  ;;  %v55_v51 = vld [vmem:[%s3896_s5 + $0x70] sm:$0xff]  ;;  %v3686_v39 = vpack.c.bf16 %v54_v10, %v53_v8 }
 0x77d   :  { %v1358_v32 = vmul.f32 %v1350_v54, %v3323_v40  ;;  %v1383_v62 = vsel %vm83_vm3, %v1382_v0, %v1381_v4  ;;  %v3692_v52 = vpack.c.bf16 %v56_v12, %v55_v51 }
 0x77e   :  { %v1365_v1 = vadd.f32 %v1357_v55, %v3326_v41  ;;  %v1388_v19 = vrot.slane %v1367_v11, 2 }
 0x77f   :  { %v1366_v5 = vadd.f32 %v1358_v32, %v3326_v41 }
 0x780   :  { %v1384_v60 = vrot.slane %v1365_v1, 4 }
 0x781   :  { %v1386_v14 = vrot.slane %v1366_v5, 3 }
 0x809   :  { %v1073_v29 = vpop.xlane.xlu0 %1072 }
 0x80a   :  { %v1074_v42 = vmul.f32 0.03125, %v1073_v29 }
 0x80c   :  { %v1075_v45 = vadd.f32 1e-05, %v1074_v42 }
 0x80e   :  { %3045 = vrsqrt.f32 %v1075_v45  ;;  %v3653_v45 = vpack.c.bf16 %v48_v44, %v47_v43 }
 0x818   :  { %v3046_v35 = vpop.eup %3045 }
 0x819   :  { %v1077_v2 = vmul.f32 %v3046_v35, %v3548_v17  ;;  %v1385_v17 = vsel %vm86_vm4, %v1384_v60, %v1383_v62 }
 0x81a   :  { %v1387_v23 = vsel %vm89_vm5, %v1386_v14, %v1385_v17 }
 0x81b   :  { %v1078_v7 = vmul.f32 %v1077_v2, %v3323_v40  ;;  %v1389_v25 = vsel %vm92_vm6, %v1388_v19, %v1387_v23 }
 0x81d   :  { %v1079_v6 = vadd.f32 %v1078_v7, %v3326_v41 }
 0x81f   :  { %2773 = vmatmul.mubr.msk.f32.vlgmr.msra.gmra.mrb[14].mxu1 %vm95_vm7, %v1079_v6 }
 0x820   :  { %2962 = vmatpush3.bf16.msra.mxu1 %v3294_v18  ;;  %2818 = vmatprep.mubr.msk.f32.mxu1 %vm3103_vm8, %v3104_v20  ;;  %v43_v18 = vld [vmem:[%s3896_s5 + $0x10] sm:$0xff] }
 0x821   :  { %2963 = vmatprep.subr.bf16.mxu1 %v3102_v16  ;;  %v3633_v29 = vpack.c.bf16 %v44_v26, %v43_v18 }
 0x823   :  { %2941 = vmatpush3.bf16.msra.mxu0 %v3633_v29 }
 0x824   :  { %2965 = vmatpush3.bf16.msra.mxu1 %v3305_v22  ;;  %2942 = vmatprep.subr.bf16.mxu0 %v3102_v16  ;;  %v45_v22 = vld [vmem:[%s3896_s5 + $0x20] sm:$0xff] }
 0x825   :  { %2821 = vmatprep.subr.mxu1 %v3104_v20  ;;  %v3643_v42 = vpack.c.bf16 %v46_v31, %v45_v22 }
 0x827   :  { %2819 = vmatmul.mubr.msk.f32.vlgmr.msra.gmra.mrb[16].mxu1 %vm95_vm7, %v1389_v25  ;;  %2944 = vmatpush3.bf16.msra.mxu0 %v3643_v42 }
 0x828   :  { %2823 = vmatprep.mubr.msk.f32.mxu1 %vm3103_vm8, %v3104_v20  ;;  %2945 = vmatprep.subr.bf16.mxu0 %v3102_v16 }
 0x82b   :  { %2947 = vmatpush3.bf16.msra.mxu0 %v3653_v45 }
 0x82c   :  { %2948 = vmatprep.subr.bf16.mxu0 %v3102_v16 }
 0x82f   :  { %2950 = vmatpush3.bf16.msra.mxu0 %v3663_v37 }
 0x830   :  { %2951 = vmatprep.subr.bf16.mxu0 %v3102_v16 }
 0x833   :  { %2953 = vmatpush3.bf16.msra.mxu0 %v3673_v38 }
 0x834   :  { %2954 = vmatprep.subr.bf16.mxu0 %v3102_v16 }
 0x837   :  { %2956 = vmatpush3.bf16.msra.mxu0 %v3686_v39 }
 0x838   :  { %2957 = vmatprep.subr.bf16.mxu0 %v3102_v16 }
 0x83b   :  { %2959 = vmatpush3.bf16.msra.mxu0 %v3692_v52 }
 0x83c   :  { %2851 = vmatprep.subr.mxu0 %v3104_v20 }
 0x8f2   :  { %v1153_v54 = vpop.f32.mrb[14].mxu1 }
 0x8f3   :  { %v1154_v59 = vadd.f32 %v1153_v54, %v3699_v15  ;;  %v2774_v55 = vpop.f32.mrb[15].mxu1 }
 0x8f5   :  { %v1158_v21 = vmul.f32 0.044715, %v1154_v59  ;;  %v1157_v2 = vmul.f32 0.5, %v1154_v59 }
 0x8f7   :  { %v1159_v56 = vmul.f32 %v1158_v21, %v1154_v59 }
 0x8f9   :  { %v1160_v58 = vmul.f32 %v1159_v56, %v1154_v59 }
 0x8fa   :  { %v1458_v61 = vpop.f32.mrb[16].mxu1 }
 0x8fb   :  { %v1161_v32 = vadd.f32 %v1160_v58, %v1154_v59  ;;  %v3703_v34 = vadd.f32 %v3365_v48, %v1458_v61  ;;  %v2820_v35 = vpop.f32.mrb[17].mxu1 }
 0x8fd   :  { %1463 = vrot.lane.b32.xlu0 %v3703_v34, %s3106_s29  ;;  %v1162_v1 = vmul.f32 0.7978846, %v1161_v32 }
 0x8ff   :  { %3047 = vtanh.f32 %v1162_v1 }
 0x901   :  { %1628 = vrot.lane.b32.xlu0 %v3703_v34, %s3107_s30 }
 0x905   :  { %1626 = vrot.lane.b32.xlu0 %v3703_v34, %s3105_s28 }
 0x909   :  { %v3048_v30 = vpop.eup %3047 }
 0x90a   :  { %v1164_v0 = vadd.f32 1.0, %v3048_v30 }
 0x90c   :  { %v1165_v3 = vmul.f32 %v1164_v0, %v1157_v2 }
 0x90e   :  { %2808 = vmatmul.mubr.f32.vlgmr.msra.gmra.mrb[6].mxu0 %v1165_v3 }
 0x90f   :  { %2853 = vmatprep.mubr.msk.f32.mxu0 %vm3103_vm8, %v3104_v20 }
 0x96f   :  { %v1464_v48 = vpop.permute.xlu0 %1463 }
 0x970   :  { %2822 = vmatpush3.xpose.msk.msra.mxu1 %vm313_vm9, %v1464_v48 }
 0x971   :  { %2826 = vmatprep.subr.mxu1 %v3104_v20 }
 0x973   :  { %2824 = vmatmul.mubr.msk.f32.vlgmr.msra.gmra.mrb[18].mxu1 %vm313_vm9, %v3703_v34  ;;  %v1629_v26 = vpop.permute.xlu0 %1628 }
 0x974   :  { %2828 = vmatprep.mubr.msk.f32.mxu1 %vm3103_vm8, %v3104_v20 }
 0x977   :  { %v1627_v31 = vpop.permute.xlu0 %1626 }
 0x9e1   :  { %v3719_v4 = vpop.f32.mrb[6].mxu0 }
 0x9e2   :  { %v2809_v7 = vpop.f32.mrb[7].mxu0 }
 0xa46   :  { %v1535_v5 = vpop.f32.mrb[18].mxu1 }
 0xa47   :  { %v2825_v60 = vpop.f32.mrb[19].mxu1  ;;  %v1539_v6 = vsel %vm313_vm9, %v1535_v5, -inf }
 0xa48   :  { %1540 = vmax.xlane.f32.xlu1 %v1539_v6 }
 0xad5   :  { %v1541_v62 = vpop.xlane.xlu1 %1540 }
 0xad6   :  { %v1542_v11 = vsub.f32 %v1535_v5, %v1541_v62 }
 0xad8   :  { %v1543_v14 = vmul.f32 1.442695, %v1542_v11 }
 0xada   :  { %3049 = vpow2.f32 %v1543_v14 }
 0xae4   :  { %v3050_v17 = vpop.eup %3049 }
 0xae5   :  { %v1545_v19 = vsel %vm313_vm9, %v3050_v17, 0.0 }
 0xae6   :  { %1546 = vadd.xlane.f32.xlu1 %v1545_v19 }
 0xaf7   :  { %1550 = vrot.lane.b32.xlu1 %v3703_v34, %s3112_s11 }
 0xb73   :  { %v1547_v23 = vpop.xlane.xlu1 %1546 }
 0xb74   :  { %3051 = vrcp.f32 %v1547_v23 }
 0xb77   :  { %v1551_v25 = vpop.permute.xlu1 %1550 }
 0xb78   :  { %2827 = vmatpush3.msra.mxu1 %v1551_v25 }
 0xb79   :  { %2831 = vmatprep.subr.mxu1 %v3104_v20 }
 0xb7e   :  { %v3052_v18 = vpop.eup %3051 }
 0xb7f   :  { %v1549_v22 = vmul.f32 %v3052_v18, %v3050_v17 }
 0xb81   :  { %2829 = vmatmul.mubr.msk.f32.vlgmr.msra.gmra.mrb[20].mxu1 %vm313_vm9, %v1549_v22 }
 0xb82   :  { %2832 = vmatpush3.xpose.msk.msra.mxu1 %vm313_vm9, %v1629_v26  ;;  %2833 = vmatprep.mubr.msk.f32.mxu1 %vm3103_vm8, %v3104_v20 }
 0xb83   :  { %2836 = vmatprep.subr.mxu1 %v3104_v20 }
 0xb85   :  { %2834 = vmatmul.mubr.msk.f32.vlgmr.msra.gmra.mrb[22].mxu1 %vm313_vm9, %v1627_v31 }
 0xb86   :  { %2838 = vmatprep.mubr.msk.f32.mxu1 %vm3103_vm8, %v3104_v20 }
 0xc54   :  { %v3734_v43 = vpop.f32.mrb[20].mxu1 }
 0xc55   :  { %v2830_v44 = vpop.f32.mrb[21].mxu1 }
 0xc58   :  { %v1700_v46 = vpop.f32.mrb[22].mxu1 }
 0xc59   :  { %v2835_v47 = vpop.f32.mrb[23].mxu1  ;;  %v1704_v49 = vsel %vm313_vm9, %v1700_v46, -inf }
 0xc5a   :  { %1705 = vmax.xlane.f32.xlu1 %v1704_v49 }
 0xc6b   :  { %1793 = vrot.lane.b32.xlu1 %v3703_v34, %s3108_s8 }
 0xc6f   :  { %1791 = vrot.lane.b32.xlu1 %v3703_v34, %s3109_s2 }
 0xc73   :  { %1956 = vrot.lane.b32.xlu1 %v3703_v34, %s3111_s10 }
 0xce7   :  { %v1706_v50 = vpop.xlane.xlu1 %1705 }
 0xce8   :  { %v1707_v8 = vsub.f32 %v1700_v46, %v1706_v50 }
 0xcea   :  { %v1708_v10 = vmul.f32 1.442695, %v1707_v8 }
 0xceb   :  { %v1794_v53 = vpop.permute.xlu1 %1793 }
 0xcec   :  { %3053 = vpow2.f32 %v1708_v10 }
 0xcef   :  { %v1792_v55 = vpop.permute.xlu1 %1791 }
 0xcf3   :  { %v1957_v58 = vpop.permute.xlu1 %1956 }
 0xcf6   :  { %v3054_v51 = vpop.eup %3053 }
 0xcf7   :  { %v1710_v12 = vsel %vm313_vm9, %v3054_v51, 0.0 }
 0xcf8   :  { %1711 = vadd.xlane.f32.xlu0 %v1710_v12 }
 0xd0e   :  { %1715 = vrot.lane.b32.xlu0 %v3703_v34, %s3115_s14 }
 0xd12   :  { %1958 = vrot.lane.b32.xlu0 %v3703_v34, %s3110_s9 }
 0xd85   :  { %v1712_v54 = vpop.xlane.xlu0 %1711 }
 0xd86   :  { %3055 = vrcp.f32 %v1712_v54 }
 0xd89   :  { %v1716_v59 = vpop.permute.xlu0 %1715 }
 0xd8a   :  { %2837 = vmatpush3.msra.mxu1 %v1716_v59 }
 0xd8b   :  { %2841 = vmatprep.subr.mxu1 %v3104_v20 }
 0xd8d   :  { %v1959_v21 = vpop.permute.xlu0 %1958 }
 0xd8e   :  { %2852 = vmatpush3.xpose.msk.msra.mxu0 %vm313_vm9, %v1959_v21 }
 0xd8f   :  { %2966 = vmatprep.subr.bf16.mxu0 %v3102_v16 }
 0xd90   :  { %v3056_v56 = vpop.eup %3055 }
 0xd91   :  { %v1714_v61 = vmul.f32 %v3056_v56, %v3054_v51  ;;  %2854 = vmatmul.mubr.msk.f32.vlgmr.msra.gmra.mrb[8].mxu0 %vm313_vm9, %v1957_v58  ;;  %v3076_v58 = vld [vmem:[%s3891_s0 + $0xe] sm:$0x3] }
 0xd92   :  { %2968 = vmatpush3.bf16.msra.mxu0 %v3443_v63  ;;  %2869 = vmatprep.mubr.msk.f32.mxu0 %vm3103_vm8, %v3104_v20 }
 0xd93   :  { %2839 = vmatmul.mubr.msk.f32.vlgmr.msra.gmra.mrb[24].mxu1 %vm313_vm9, %v1714_v61  ;;  %2969 = vmatprep.subr.bf16.mxu0 %v3102_v16  ;;  %v2221_v61 = vrot.slane %v3076_v58, 2 }
 0xd94   :  { %2842 = vmatpush3.xpose.msk.msra.mxu1 %vm313_vm9, %v1794_v53  ;;  %2843 = vmatprep.mubr.msk.f32.mxu1 %vm3103_vm8, %v3104_v20  ;;  %v3074_v53 = vld [vmem:[%s3891_s0 + $0xa] sm:$0x3] }
 0xd95   :  { %2846 = vmatprep.subr.mxu1 %v3104_v20  ;;  %v2217_v54 = vrot.slane %v3074_v53, 4 }
 0xd96   :  { %2971 = vmatpush3.bf16.msra.mxu0 %v3453_v24 }
 0xd97   :  { %2844 = vmatmul.mubr.msk.f32.vlgmr.msra.gmra.mrb[26].mxu1 %vm313_vm9, %v1792_v55  ;;  %2978 = vmatprep.subr.bf16.mxu0 %v3102_v16  ;;  %v3075_v55 = vld [vmem:[%s3891_s0 + $0xc] sm:$0x3] }
 0xd98   :  { %2848 = vmatprep.mubr.msk.f32.mxu1 %vm3103_vm8, %v3104_v20  ;;  %v2219_v21 = vrot.slane %v3075_v55, 3 }
 0xe64   :  { %v2030_v63 = vpop.f32.mrb[8].mxu0 }
 0xe65   :  { %v2855_v32 = vpop.f32.mrb[9].mxu0  ;;  %v2034_v35 = vsel %vm313_vm9, %v2030_v63, -inf }
 0xe66   :  { %2035 = vmax.xlane.f32.xlu1 %v2034_v35  ;;  %v1787_v1 = vpop.f32.mrb[24].mxu1 }
 0xe67   :  { %v2840_v30 = vpop.f32.mrb[25].mxu1 }
 0xe6a   :  { %v1865_v2 = vpop.f32.mrb[26].mxu1 }
 0xe6b   :  { %v2845_v0 = vpop.f32.mrb[27].mxu1  ;;  %v1869_v3 = vsel %vm313_vm9, %v1865_v2, -inf }
 0xe6c   :  { %1870 = vmax.xlane.f32.xlu0 %v1869_v3 }
 0xe77   :  { %1880 = vrot.lane.b32.xlu1 %v3703_v34, %s3113_s12 }
 0xe7b   :  { %2122 = vrot.lane.b32.xlu1 %v1787_v1, %s3116_s23 }
 0xef3   :  { %v2036_v24 = vpop.xlane.xlu1 %2035 }
 0xef4   :  { %v2037_v48 = vsub.f32 %v2030_v63, %v2036_v24 }
 0xef6   :  { %v2038_v7 = vmul.f32 1.442695, %v2037_v48 }
 0xef7   :  { %v1881_v5 = vpop.permute.xlu1 %1880 }
 0xef8   :  { %3057 = vpow2.f32 %v2038_v7  ;;  %2847 = vmatpush3.msra.mxu1 %v1881_v5 }
 0xef9   :  { %v1871_v60 = vpop.xlane.xlu0 %1870  ;;  %2856 = vmatprep.subr.mxu1 %v3104_v20 }
 0xefa   :  { %v1872_v6 = vsub.f32 %v1865_v2, %v1871_v60 }
 0xefb   :  { %v2123_v50 = vpop.permute.xlu1 %2122 }
 0xefc   :  { %v1873_v62 = vmul.f32 1.442695, %v1872_v6 }
 0xefe   :  { %3059 = vpow2.f32 %v1873_v62 }
 0xf02   :  { %v3058_v11 = vpop.eup %3057 }
 0xf03   :  { %v2040_v14 = vsel %vm313_vm9, %v3058_v11, 0.0 }
 0xf04   :  { %2041 = vadd.xlane.f32.xlu0 %v2040_v14 }
 0xf08   :  { %v3060_v17 = vpop.eup %3059 }
 0xf09   :  { %v1875_v19 = vsel %vm313_vm9, %v3060_v17, 0.0 }
 0xf0a   :  { %1876 = vadd.xlane.f32.xlu0 %v1875_v19 }
 0xf20   :  { %2045 = vrot.lane.b32.xlu0 %v3703_v34, %s3114_s13 }
 0xf91   :  { %v2042_v23 = vpop.xlane.xlu0 %2041 }
 0xf97   :  { %v1877_v25 = vpop.xlane.xlu0 %1876 }
 0xf98   :  { %3061 = vrcp.f32 %v1877_v25 }
 0xf99   :  { %3063 = vrcp.f32 %v2042_v23 }
 0xf9b   :  { %v2046_v31 = vpop.permute.xlu0 %2045 }
 0xfa2   :  { %v3062_v18 = vpop.eup %3061 }
 0xfa3   :  { %v1879_v26 = vmul.f32 %v3062_v18, %v3060_v17  ;;  %v3064_v22 = vpop.eup %3063 }
 0xfa4   :  { %v2044_v44 = vmul.f32 %v3064_v22, %v3058_v11 }
 0xfa5   :  { %2849 = vmatmul.mubr.msk.f32.vlgmr.msra.gmra.mrb[28].mxu1 %vm313_vm9, %v1879_v26 }
 0xfa6   :  { %2857 = vmatpush3.msra.mxu1 %v2046_v31  ;;  %2858 = vmatprep.mubr.msk.f32.mxu1 %vm3103_vm8, %v3104_v20 }
 0xfa7   :  { %2972 = vmatprep.subr.bf16.mxu1 %v3102_v16 }
 0xfa9   :  { %2859 = vmatmul.mubr.msk.f32.vlgmr.msra.gmra.mrb[30].mxu1 %vm313_vm9, %v2044_v44 }
 0xfaa   :  { %2974 = vmatpush3.bf16.msra.mxu1 %v3559_v57  ;;  %2880 = vmatprep.mubr.msk.f32.mxu1 %vm3103_vm8, %v3104_v20  ;;  %v2133_v57 = vsel %vm313_vm9, %v3734_v43, %v2123_v50 }
 0xfab   :  { %2975 = vmatprep.subr.bf16.mxu1 %v3102_v16 }
 0xfae   :  { %2977 = vmatpush3.bf16.msra.mxu1 %v3569_v33 }
0x1078   :  { %v1952_v34 = vpop.f32.mrb[28].mxu1 }
0x1079   :  { %2126 = vrot.lane.b32.xlu1 %v1952_v34, %s3117_s24  ;;  %v2850_v46 = vpop.f32.mrb[29].mxu1 }
0x107c   :  { %v2117_v47 = vpop.f32.mrb[30].mxu1 }
0x107d   :  { %2130 = vrot.lane.b32.xlu0 %v2117_v47, %s3118_s1  ;;  %v2860_v49 = vpop.f32.mrb[31].mxu1 }
0x10eb   :  { %v2127_v8 = vpop.permute.xlu1 %2126 }
0x10ec   :  { %v2134_v10 = vsel %vm983_vm12, %v2133_v57, %v2127_v8 }
0x10ef   :  { %v2131_v51 = vpop.permute.xlu0 %2130 }
0x10f0   :  { %v2135_v12 = vsel %vm985_vm13, %v2134_v10, %v2131_v51 }
0x10f1   :  { %2870 = vmatmul.mubr.msk.f32.vlgmr.msra.gmra.mrb[10].mxu0 %vm95_vm7, %v2135_v12 }
0x10f2   :  { %2980 = vmatpush3.bf16.msra.mxu0 %v3579_v36  ;;  %2915 = vmatprep.mubr.msk.f32.mxu0 %vm3103_vm8, %v3104_v20  ;;  %v3069_v20 = vld [vmem:[%s3891_s0] sm:$0x3]  ;;  %v3070_v36 = vld [vmem:[%s3891_s0 + $0x4] sm:$0x3] }
0x10f3   :  { %2981 = vmatprep.subr.bf16.mxu0 %v3102_v16  ;;  %v2209_v33 = vrot.slane %v3069_v20, 1 }
0x10f6   :  { %2983 = vmatpush3.bf16.msra.mxu0 %v3633_v29  ;;  %v2211_v29 = vrot.slane %v3070_v36, 7 }
0x10f7   :  { %2984 = vmatprep.subr.bf16.mxu0 %v3102_v16 }
0x10fa   :  { %2986 = vmatpush3.bf16.msra.mxu0 %v3643_v42  ;;  %v3071_v42 = vld [vmem:[%s3891_s0 + $0x2] sm:$0x3] }
0x10fb   :  { %2987 = vmatprep.subr.bf16.mxu0 %v3102_v16 }
0x10fe   :  { %2989 = vmatpush3.bf16.msra.mxu0 %v3653_v45  ;;  %v2210_v45 = vsel %vm74_vm0, %v3071_v42, %v2209_v33 }
0x10ff   :  { %2990 = vmatprep.subr.bf16.mxu0 %v3102_v16 }
0x1102   :  { %2992 = vmatpush3.bf16.msra.mxu0 %v3663_v37 }
0x1103   :  { %2993 = vmatprep.subr.bf16.mxu0 %v3102_v16 }
0x1106   :  { %2995 = vmatpush3.bf16.msra.mxu0 %v3673_v38  ;;  %v2212_v38 = vsel %vm77_vm1, %v2211_v29, %v2210_v45 }
0x1107   :  { %2996 = vmatprep.subr.bf16.mxu0 %v3102_v16 }
0x110a   :  { %2998 = vmatpush3.bf16.msra.mxu0 %v3686_v39  ;;  %v3073_v39 = vld [vmem:[%s3891_s0 + $0x8] sm:$0x3] }
0x110b   :  { %2999 = vmatprep.subr.bf16.mxu0 %v3102_v16  ;;  %v3072_v16 = vld [vmem:[%s3891_s0 + $0x6] sm:$0x3] }
0x110c   :  { %v2213_v37 = vrot.slane %v3072_v16, 6 }
0x110e   :  { %3001 = vmatpush3.bf16.msra.mxu0 %v3692_v52  ;;  %v2215_v52 = vrot.slane %v3073_v39, 5  ;;  %v2214_v43 = vsel %vm80_vm2, %v2213_v37, %v2212_v38 }
0x1110   :  { %v2216_v59 = vsel %vm83_vm3, %v2215_v52, %v2214_v43 }
0x1111   :  { %v2218_v56 = vsel %vm86_vm4, %v2217_v54, %v2216_v59 }
0x1112   :  { %v2220_v63 = vsel %vm89_vm5, %v2219_v21, %v2218_v56 }
0x1113   :  { %v2222_v35 = vsel %vm92_vm6, %v2221_v61, %v2220_v63 }
0x11c4   :  { %v2205_v32 = vpop.f32.mrb[10].mxu0 }
0x11c5   :  { %v2206_v1 = vadd.f32 %v2205_v32, %v3539_v9  ;;  %v2871_v30 = vpop.f32.mrb[11].mxu0 }
0x11c7   :  { %v2224_v2 = vadd.f32 %v2222_v35, %v2206_v1 }
0x11c9   :  { %v2225_v0 = vsel %vm95_vm7, %v2224_v2, 0.0 }
0x11ca   :  { %2226 = vadd.xlane.f32.xlu1 %v2225_v0 }
0x1257   :  { %v2227_v3 = vpop.xlane.xlu1 %2226 }
0x1258   :  { %v2228_v24 = vmul.f32 0.03125, %v2227_v3 }
0x125a   :  { %v2229_v48 = vsub.f32 %v2224_v2, %v2228_v24 }
0x125c   :  { %v2230_v7 = vmul.f32 %v2229_v48, %v2229_v48 }
0x125e   :  { %v2231_v5 = vsel %vm95_vm7, %v2230_v7, 0.0 }
0x125f   :  { %2232 = vadd.xlane.f32.xlu0 %v2231_v5 }
0x12ec   :  { %v2233_v60 = vpop.xlane.xlu0 %2232 }
0x12ed   :  { %v2234_v6 = vmul.f32 0.03125, %v2233_v60 }
0x12ef   :  { %v2235_v62 = vadd.f32 1e-05, %v2234_v6 }
0x12f1   :  { %3065 = vrsqrt.f32 %v2235_v62 }
0x12fb   :  { %v3066_v11 = vpop.eup %3065 }
0x12fc   :  { %v2237_v14 = vmul.f32 %v3066_v11, %v2229_v48 }
0x12fe   :  { %v2238_v9 = vmul.f32 %v2237_v14, %v3323_v40  ;;  %v1168_v40 = vsub.s32 3, %v3310_v27 }
0x1300   :  { %v2239_v17 = vadd.f32 %v2238_v9, %v3326_v41  ;;  %v3077_v41 = vld [vmem:[%s3897_s6] sm:$0xff]  ;;  %s3120_s6 = smov [#allocation2]  }
0x1301   :  { %v1169_v50 = vrot.slane %v3077_v41, %v1168_v40  ;;  %s2564_s27 = sshll.u32 %s3120_s6, 4  ;;  %s2565_s27 = int_to_ptr.vmem [resolvable:$true] %s2564_s27 }
0x1302   :  { %2881 = vmatmul.mubr.msk.f32.vlgmr.msra.gmra.mrb[32].mxu1 %vm95_vm7, %v2239_v17  ;;  %s3078_s15 = scalar_lea.vmem %s2565_s27, 256  ;;  %p3083_p1 = scmp.lt.s32.totalorder %s2565_s27, %s2565_s27 }
0x1303   :  { %v1237_v57 = vadd.f32 %v3719_v4, %v1169_v50  ;;  %p3079_p0 = scmp.ne.s32.totalorder %s2565_s27, %s3078_s15  ;;  %p3084_p2 = scmp.lt.s32.totalorder %s3078_s15, %s3078_s15 }
0x1305   :  { %v1240_v51 = vadd.f32 %v1237_v57, %v3543_v13  ;;  %p3085_p3 = por %p3084_p2, %p3083_p1 }
0x1307   :  { %v2394_v20 = vcombine.high %v1240_v51, %v1240_v51  ;;  %p3086_p4 = pnand %p3085_p3, %p3079_p0 }
0x13d5   :  { %v2309_v19 = vpop.f32.mrb[32].mxu1 }
0x13d6   :  { %v2310_v23 = vadd.f32 %v2309_v19, %v3699_v15  ;;  %v2882_v25 = vpop.f32.mrb[33].mxu1  ;;  %v3119_v15 = vmov 1966171168  }
0x13d7   :  { %v2396_v8 = vunpack.c.l.s4 %v3119_v15 }
0x13d8   :  { %v2314_v18 = vmul.f32 0.044715, %v2310_v23  ;;  %v2313_v46 = vmul.f32 0.5, %v2310_v23 }
0x13d9   :  { %v2397_v10 = vunpack.c.0.s8 %v2396_v8 }
0x13da   :  { %v2315_v26 = vmul.f32 %v2314_v18, %v2310_v23 }
0x13db   :  { %v2400_v12 = vsub.s32 %v2397_v10, %v3310_v27 }
0x13dc   :  { %v2316_v22 = vmul.f32 %v2315_v26, %v2310_v23 }
0x13dd   :  { %v2401_v33 = vrot.slane %v1240_v51, %v2400_v12  ;;  %v2408_v45 = vrot.slane %v2394_v20, %v2400_v12 }
0x13de   :  { %v2317_v31 = vadd.f32 %v2316_v22, %v2310_v23 }
0x13df   :  { %v2409_v37 = vcombine.high %v2401_v33, %v2401_v33  ;;  %v2417_v38 = vrot.slane %v2401_v33, %v2400_v12  ;;  %v2410_v43 = vcombine.high %v2408_v45, %v2408_v45  ;;  %v2424_v53 = vrot.slane %v2408_v45, %v2400_v12 }
0x13e0   :  { %v2318_v44 = vmul.f32 0.7978846, %v2317_v31 }
0x13e1   :  { %v2431_v55 = vrot.slane %v2409_v37, %v2400_v12  ;;  %v2439_v13 = vcombine.high %v2417_v38, %v2417_v38  ;;  %v2438_v61 = vrot.slane %v2410_v43, %v2400_v12  ;;  %v2440_v63 = vcombine.high %v2424_v53, %v2424_v53 }
0x13e2   :  { %3067 = vtanh.f32 %v2318_v44 }
0x13e3   :  { %v2441_v0 = vcombine.high %v2431_v55, %v2431_v55  ;;  %v2442_v62 = vcombine.high %v2438_v61, %v2438_v61 }
0x13ec   :  { %v3068_v34 = vpop.eup %3067 }
0x13ed   :  { %v2320_v47 = vadd.f32 1.0, %v3068_v34 }
0x13ef   :  { %v2321_v49 = vmul.f32 %v2320_v47, %v2313_v46 }
0x13f1   :  { %2916 = vmatmul.mubr.f32.vlgmr.msra.gmra.mrb[12].mxu0 %v2321_v49 }
0x14c4   :  { %v2388_v36 = vpop.f32.mrb[12].mxu0 }
0x14c5   :  { %v2389_v29 = vadd.f32 %v2388_v36, %v1169_v50  ;;  %v2917_v42 = vpop.f32.mrb[13].mxu0 }
0x14c7   :  { %v2392_v16 = vadd.f32 %v2389_v29, %v2224_v2 }
0x14c9   :  { %v2452_v39 = vcombine.high %v2392_v16, %v2392_v16  ;;  %v2459_v52 = vrot.slane %v2392_v16, %v2400_v12 }
0x14cb   :  { %v2466_v54 = vrot.slane %v2452_v39, %v2400_v12  ;;  %v2467_v4 = vcombine.high %v2459_v52, %v2459_v52  ;;  %v2475_v59 = vrot.slane %v2459_v52, %v2400_v12 }
0x14cd   :  { %v2468_v27 = vcombine.high %v2466_v54, %v2466_v54  ;;  %v2482_v21 = vrot.slane %v2466_v54, %v2400_v12  ;;  %v2489_v56 = vrot.slane %v2467_v4, %v2400_v12  ;;  %v2497_v58 = vcombine.high %v2475_v59, %v2475_v59 }
0x14ce   :  { %v2504_v32 = vrot.slane %v2475_v59, %v3313_v28 }
0x14cf   :  { %v2496_v35 = vrot.slane %v2468_v27, %v2400_v12  ;;  %v2498_v1 = vcombine.high %v2482_v21, %v2482_v21  ;;  %v2499_v30 = vcombine.high %v2489_v56, %v2489_v56  ;;  %v2508_v2 = vrot.slane %v2489_v56, %v3313_v28 }
0x14d0   :  { %v2512_v3 = vrot.slane %v2497_v58, %v3313_v28  ;;  %v2520_v24 = vrot.slane %v2482_v21, %v3313_v28  ;;  %v2542_v48 = vsel %vm2541_vm14, %v2417_v38, %v2504_v32 }
0x14d1   :  { %v2500_v7 = vcombine.high %v2496_v35, %v2496_v35  ;;  %v2516_v5 = vrot.slane %v2499_v30, %v3313_v28  ;;  %v2524_v60 = vrot.slane %v2496_v35, %v3313_v28  ;;  %v2528_v6 = vrot.slane %v2498_v1, %v3313_v28  ;;  %2551 = vst.msk [vmem:[#allocation2] sm:$0x3] %vm2550_vm15, %v2542_v48 }
0x14d2   :  { %v2543_v11 = vsel %vm2541_vm14, %v2431_v55, %v2508_v2  ;;  %v2544_v14 = vsel %vm2541_vm14, %v2439_v13, %v2512_v3  ;;  %v2546_v9 = vsel %vm2541_vm14, %v2424_v53, %v2520_v24 }
0x14d3   :  { %v2532_v17 = vrot.slane %v2500_v7, %v3313_v28  ;;  %v2545_v19 = vsel %vm2541_vm14, %v2441_v0, %v2516_v5  ;;  %v2547_v23 = vsel %vm2541_vm14, %v2438_v61, %v2524_v60  ;;  %v2548_v25 = vsel %vm2541_vm14, %v2440_v63, %v2528_v6  ;;  %2552 = vst.msk [vmem:[#allocation2 + $0x2] sm:$0x3] %vm2550_vm15, %v2543_v11 }
0x14d4   :  { %2553 = vst.msk [vmem:[#allocation2 + $0x4] sm:$0x3] %vm2550_vm15, %v2544_v14  ;;  %2555 = vst.msk [vmem:[#allocation2 + $0x8] sm:$0x3] %vm2550_vm15, %v2546_v9 }
0x14d5   :  { %2554 = vst.msk [vmem:[#allocation2 + $0x6] sm:$0x3] %vm2550_vm15, %v2545_v19  ;;  %2556 = vst.msk [vmem:[#allocation2 + $0xa] sm:$0x3] %vm2550_vm15, %v2547_v23  ;;  %v2549_v28 = vsel %vm2541_vm14, %v2442_v62, %v2532_v17 }
0x14d6   :  { %2557 = vst.msk [vmem:[#allocation2 + $0xc] sm:$0x3] %vm2550_vm15, %v2548_v25  ;;  %2558 = vst.msk [vmem:[#allocation2 + $0xe] sm:$0x3] %vm2550_vm15, %v2549_v28 }
0x14d7   :  { %3089 = shalt.err (!%p3086_p4)
}
0x14d8   :  { %s3090_s18 = scalar_lea.hbm %s3898_s7, 256 }
0x14d9   :  { %p3091_p5 = scmp.ne.s32.totalorder %s3898_s7, %s3090_s18  ;;  %p3094_p6 = scmp.lt.u32.totalorder %s3090_s18, %s3898_s7 }
0x14db   :  { %p3096_p7 = pnand %p3094_p6, %p3091_p5 }
0x14dd   :  { %3099 = shalt.err (!%p3096_p7)
}
0x14de   :  { %s3121_s4 = smov 32   ;;  %s3122_s3 = smov 2  }
0x14df   :  { %2570 = dma.vmem_to_hbm [thread:$0]  %s2565_s27, 256, %s3898_s7, [#allocation3], %s3121_s4, %s3121_s4, %s3122_s3  }
0x14e0   :  { %3100 = dma.done.wait [#allocation3], 256  }
0x14e1   :  { %3101 = vsyncadd [#allocation3], 4294967040 }
0x14e2   :  { %2574 = vsyncpa [#allocation3], 1 }

</bundles_post_ra>
